<compile_context>
chip_gen: v7x
topology: tpu7x:2x2x1
jax: 0.10.0
libtpu: 0.0.40
codegen_flags: <defaults>
</compile_context>

<pallas_src>
import functools

import jax
import jax.numpy as jnp
from jax import lax
from jax.experimental import pallas as pl
from jax.experimental.pallas import tpu as pltpu


def bilstm_kernel(x_ref, len_ref,
                  wih_f_ref, whh_f_ref, b_f_ref,
                  wih_b_ref, whh_b_ref, b_b_ref,
                  out_ref,
                  gf_scr, gb_scr,
                  *, T, B, H, unroll):
    """Fused bidirectional LSTM.

    x_ref   : (T*B, D)   time-major, batch padded to a multiple of 8
    len_ref : (B, 1)     int32 lengths (0 for padded batch rows)
    out_ref : (T*B, 2H)  forward hidden in lanes [0:H), backward in [H:2H)
    gf_scr / gb_scr : (T*B, 4H) VMEM scratch for pre-computed input gates
    """
    # ---- Stage 1: input projection for ALL timesteps, one big MXU matmul
    #      per direction (bias folded in here). ----
    x = x_ref[...]                                           # (T*B, D)
    gf_scr[...] = (jnp.dot(x, wih_f_ref[...],
                           preferred_element_type=jnp.float32) + b_f_ref[...])
    gb_scr[...] = (jnp.dot(x, wih_b_ref[...],
                           preferred_element_type=jnp.float32) + b_b_ref[...])

    # ---- hoisted loop invariants ----
    whh_f = whh_f_ref[...]                                   # (H, 4H)
    whh_b = whh_b_ref[...]                                   # (H, 4H)
    len_bh = jnp.broadcast_to(len_ref[...], (B, H))          # (B, H) int32

    zeros_h = jnp.zeros((B, H), jnp.float32)

    def gates_to_hc(gates, c):
        # PyTorch LSTM gate order: i, f, g, o
        i = jax.nn.sigmoid(gates[:, 0 * H:1 * H])
        f = jax.nn.sigmoid(gates[:, 1 * H:2 * H])
        g = jnp.tanh(gates[:, 2 * H:3 * H])
        o = jax.nn.sigmoid(gates[:, 3 * H:4 * H])
        c_new = f * c + i * g
        h_new = o * jnp.tanh(c_new)
        return h_new, c_new

    # ---- Stage 2: fused forward/backward recurrence (two independent
    #      dependency chains per iteration). ----
    def step(s, carry):
        h_f, c_f, h_b, c_b = carry
        t_f = s
        t_b = T - 1 - s
        row_f = pl.multiple_of(t_f * B, B)
        row_b = pl.multiple_of(t_b * B, B)

        g_f = gf_scr[pl.ds(row_f, B), :] + jnp.dot(
            h_f, whh_f, preferred_element_type=jnp.float32)
        g_b = gb_scr[pl.ds(row_b, B), :] + jnp.dot(
            h_b, whh_b, preferred_element_type=jnp.float32)

        h_f_new, c_f_new = gates_to_hc(g_f, c_f)
        h_b_new, c_b_new = gates_to_hc(g_b, c_b)

        valid_f = len_bh > t_f                               # (B, H) bool
        valid_b = len_bh > t_b

        out_ref[pl.ds(row_f, B), 0:H] = jnp.where(
            valid_f, h_f_new, 0.0).astype(out_ref.dtype)
        out_ref[pl.ds(row_b, B), H:2 * H] = jnp.where(
            valid_b, h_b_new, 0.0).astype(out_ref.dtype)

        h_f = jnp.where(valid_f, h_f_new, h_f)
        c_f = jnp.where(valid_f, c_f_new, c_f)
        h_b = jnp.where(valid_b, h_b_new, h_b)
        c_b = jnp.where(valid_b, c_b_new, c_b)
        return (h_f, c_f, h_b, c_b)

    lax.fori_loop(0, T, step, (zeros_h, zeros_h, zeros_h, zeros_h),
                  unroll=unroll)


def init_rnn_params(key, d_input, d_hidden):
    """Deterministic init matching nn.LSTM shapes: per direction
    weight_ih (4H, D), weight_hh (4H, H), bias_ih (4H,), bias_hh (4H,)."""
    H = d_hidden // 2
    k = 1.0 / jnp.sqrt(jnp.float32(H))
    keys = jax.random.split(key, 8)

    def u(kk, shape):
        return jax.random.uniform(kk, shape, jnp.float32, minval=-k, maxval=k)

    wih_f = u(keys[0], (4 * H, d_input))
    whh_f = u(keys[1], (4 * H, H))
    bih_f = u(keys[2], (4 * H,))
    bhh_f = u(keys[3], (4 * H,))
    wih_b = u(keys[4], (4 * H, d_input))
    whh_b = u(keys[5], (4 * H, H))
    bih_b = u(keys[6], (4 * H,))
    bhh_b = u(keys[7], (4 * H,))

    return {
        "H": H,
        # pre-transposed for x @ W^T in-kernel, biases pre-summed
        "wih_f_T": wih_f.T, "whh_f_T": whh_f.T,
        "b_f": (bih_f + bhh_f).reshape(1, 4 * H),
        "wih_b_T": wih_b.T, "whh_b_T": whh_b.T,
        "b_b": (bih_b + bhh_b).reshape(1, 4 * H),
    }


def rnn_forward(text, text_len, params):
    """RNN.forward with pooling=None, dropout=0, initial=None.

    text:     (B, T, d_input) float32
    text_len: (B,) int32
    returns word: (B, T, d_hidden) float32, zero-padded past each length.
    """
    B, T, D = text.shape
    H = params["H"]
    B_p = ((B + 7) // 8) * 8                     # pad batch to sublane multiple

    # Pad batch, go time-major, flatten to a 2-D row slab (rows = t*B_p + b).
    x_pad = jnp.zeros((B_p, T, D), jnp.float32).at[:B].set(
        text.astype(jnp.float32))
    x_flat = jnp.transpose(x_pad, (1, 0, 2)).reshape(T * B_p, D)
    len_p = jnp.zeros((B_p, 1), jnp.int32).at[:B, 0].set(
        text_len.astype(jnp.int32))

    kernel = functools.partial(
        bilstm_kernel, T=T, B=B_p, H=H,
        unroll=(True if T <= 16 else 8))
    vmem = pl.BlockSpec(memory_space=pltpu.MemorySpace.VMEM)

    out = pl.pallas_call(
        kernel,
        out_shape=jax.ShapeDtypeStruct((T * B_p, 2 * H), jnp.float32),
        in_specs=[vmem] * 8,
        out_specs=vmem,
        scratch_shapes=[pltpu.VMEM((T * B_p, 4 * H), jnp.float32),
                        pltpu.VMEM((T * B_p, 4 * H), jnp.float32)],
    )(x_flat, len_p,
      params["wih_f_T"], params["whh_f_T"], params["b_f"],
      params["wih_b_T"], params["whh_b_T"], params["b_b"])

    # (T*B_p, 2H) -> (B, T, 2H)
    word = out.reshape(T, B_p, 2 * H).transpose(1, 0, 2)[:B]
    return word

# TODO(synk): pooling branches ('last'/'max'/'mean'/'attn' via AttnWord) are not
# exercised by the default pooling=None path and are not implemented here.


if __name__ == "__main__":
    B, T, D, D_HIDDEN = 2, 8, 32, 32   # d_hidden=32 -> 16 hidden units/direction

    key = jax.random.PRNGKey(0)
    k_x, k_p = jax.random.split(key)

    text = jax.random.normal(k_x, (B, T, D), dtype=jnp.float32)
    text_len = jnp.array([T, 5], dtype=jnp.int32)
    # text_mask only needed for max/mean pooling; unused with pooling=None.
    text_mask = (jnp.arange(T)[None, :] < text_len[:, None]).astype(jnp.float32)

    params = init_rnn_params(k_p, D, D_HIDDEN)

    word = rnn_forward(text, text_len, params)
    jax.block_until_ready(word)

    assert word.shape == (B, T, D_HIDDEN)
    print("KERNEL_OK")
</pallas_src>

<mosaic_0001>
module attributes {stable_mosaic.version = 11 : i64} {
  func.func @bilstm_kernel(%arg0: memref<64x32xf32, #tpu.memory_space<vmem>>, %arg1: memref<8x1xi32, #tpu.memory_space<vmem>>, %arg2: memref<32x64xf32, #tpu.memory_space<vmem>>, %arg3: memref<16x64xf32, #tpu.memory_space<vmem>>, %arg4: memref<1x64xf32, #tpu.memory_space<vmem>>, %arg5: memref<32x64xf32, #tpu.memory_space<vmem>>, %arg6: memref<16x64xf32, #tpu.memory_space<vmem>>, %arg7: memref<1x64xf32, #tpu.memory_space<vmem>>, %arg8: memref<64x32xf32, #tpu.memory_space<vmem>>, %arg9: memref<64x64xf32, #tpu.memory_space<vmem>>, %arg10: memref<64x64xf32, #tpu.memory_space<vmem>>) attributes {dimension_semantics = [], scalar_prefetch = 0 : i64, scratch_operands = 2 : i64, tpu.core_type = #tpu.core_type<tc>} {
    %c0 = arith.constant 0 : index
    %c0_0 = arith.constant 0 : index
    %0 = vector.load %arg0[%c0, %c0_0] : memref<64x32xf32, #tpu.memory_space<vmem>>, vector<64x32xf32>
    %c0_1 = arith.constant 0 : index
    %c0_2 = arith.constant 0 : index
    %1 = vector.load %arg2[%c0_1, %c0_2] : memref<32x64xf32, #tpu.memory_space<vmem>>, vector<32x64xf32>
    %cst = arith.constant dense<0.000000e+00> : vector<64x64xf32>
    %2 = tpu.matmul %0, %1, %cst {dimension_numbers = #tpu.dot_dimension_numbers<[1], [0], [0], [1], [0, 0, 1, 1], [], []>} : vector<64x32xf32>, vector<32x64xf32>, vector<64x64xf32> -> vector<64x64xf32>
    %c0_3 = arith.constant 0 : index
    %c0_4 = arith.constant 0 : index
    %3 = vector.load %arg4[%c0_3, %c0_4] : memref<1x64xf32, #tpu.memory_space<vmem>>, vector<1x64xf32>
    %4 = vector.broadcast %3 : vector<1x64xf32> to vector<64x64xf32>
    %5 = arith.addf %2, %4 : vector<64x64xf32>
    %c0_5 = arith.constant 0 : index
    %c0_6 = arith.constant 0 : index
    %6 = vector.load %arg9[%c0_5, %c0_6] : memref<64x64xf32, #tpu.memory_space<vmem>>, vector<64x64xf32>
    tpu.vector_store %arg9[%c0_5, %c0_6], %5 {strides = array<i32>} : memref<64x64xf32, #tpu.memory_space<vmem>>, vector<64x64xf32>,
    %c0_7 = arith.constant 0 : index
    %c0_8 = arith.constant 0 : index
    %7 = vector.load %arg5[%c0_7, %c0_8] : memref<32x64xf32, #tpu.memory_space<vmem>>, vector<32x64xf32>
    %cst_9 = arith.constant dense<0.000000e+00> : vector<64x64xf32>
    %8 = tpu.matmul %0, %7, %cst_9 {dimension_numbers = #tpu.dot_dimension_numbers<[1], [0], [0], [1], [0, 0, 1, 1], [], []>} : vector<64x32xf32>, vector<32x64xf32>, vector<64x64xf32> -> vector<64x64xf32>
    %c0_10 = arith.constant 0 : index
    %c0_11 = arith.constant 0 : index
    %9 = vector.load %arg7[%c0_10, %c0_11] : memref<1x64xf32, #tpu.memory_space<vmem>>, vector<1x64xf32>
    %10 = vector.broadcast %9 : vector<1x64xf32> to vector<64x64xf32>
    %11 = arith.addf %8, %10 : vector<64x64xf32>
    %c0_12 = arith.constant 0 : index
    %c0_13 = arith.constant 0 : index
    %12 = vector.load %arg10[%c0_12, %c0_13] : memref<64x64xf32, #tpu.memory_space<vmem>>, vector<64x64xf32>
    tpu.vector_store %arg10[%c0_12, %c0_13], %11 {strides = array<i32>} : memref<64x64xf32, #tpu.memory_space<vmem>>, vector<64x64xf32>,
    %c0_14 = arith.constant 0 : index
    %c0_15 = arith.constant 0 : index
    %13 = vector.load %arg3[%c0_14, %c0_15] : memref<16x64xf32, #tpu.memory_space<vmem>>, vector<16x64xf32>
    %c0_16 = arith.constant 0 : index
    %c0_17 = arith.constant 0 : index
    %14 = vector.load %arg6[%c0_16, %c0_17] : memref<16x64xf32, #tpu.memory_space<vmem>>, vector<16x64xf32>
    %c0_18 = arith.constant 0 : index
    %c0_19 = arith.constant 0 : index
    %15 = vector.load %arg1[%c0_18, %c0_19] : memref<8x1xi32, #tpu.memory_space<vmem>>, vector<8x1xi32>
    %16 = vector.shape_cast %15 : vector<8x1xi32> to vector<8x1xi32>
    %17 = vector.broadcast %16 : vector<8x1xi32> to vector<8x16xi32>
    %cst_20 = arith.constant 0.000000e+00 : f32
    %18 = vector.broadcast %cst_20 : f32 to vector<8x16xf32>
    %c0_i32 = arith.constant 0 : i32
    %c7_i32 = arith.constant 7 : i32
    %19 = arith.subi %c7_i32, %c0_i32 : i32
    %c8_i32 = arith.constant 8 : i32
    %20 = arith.muli %c0_i32, %c8_i32 : i32
    %21 = tpu.assume_multiple %20, 8 : i32
    %c8_i32_21 = arith.constant 8 : i32
    %22 = arith.muli %19, %c8_i32_21 : i32
    %23 = tpu.assume_multiple %22, 8 : i32
    %24 = arith.index_cast %21 : i32 to index
    %c0_22 = arith.constant 0 : index
    %25 = vector.load %arg9[%24, %c0_22] : memref<64x64xf32, #tpu.memory_space<vmem>>, vector<8x64xf32>
    %cst_23 = arith.constant dense<0.000000e+00> : vector<8x64xf32>
    %26 = tpu.matmul %18, %13, %cst_23 {dimension_numbers = #tpu.dot_dimension_numbers<[1], [0], [0], [1], [0, 0, 1, 1], [], []>} : vector<8x16xf32>, vector<16x64xf32>, vector<8x64xf32> -> vector<8x64xf32>
    %27 = arith.addf %25, %26 : vector<8x64xf32>
    %28 = arith.index_cast %23 : i32 to index
    %c0_24 = arith.constant 0 : index
    %29 = vector.load %arg10[%28, %c0_24] : memref<64x64xf32, #tpu.memory_space<vmem>>, vector<8x64xf32>
    %cst_25 = arith.constant dense<0.000000e+00> : vector<8x64xf32>
    %30 = tpu.matmul %18, %14, %cst_25 {dimension_numbers = #tpu.dot_dimension_numbers<[1], [0], [0], [1], [0, 0, 1, 1], [], []>} : vector<8x16xf32>, vector<16x64xf32>, vector<8x64xf32> -> vector<8x64xf32>
    %31 = arith.addf %29, %30 : vector<8x64xf32>
    %32 = vector.extract_strided_slice %27 {offsets = [0, 0], sizes = [8, 16], strides = [1, 1]} : vector<8x64xf32> to vector<8x16xf32>
    %33 = arith.negf %32 : vector<8x16xf32>
    %34 = math.exp %33 : vector<8x16xf32>
    %cst_26 = arith.constant 1.000000e+00 : f32
    %35 = vector.broadcast %cst_26 : f32 to vector<8x16xf32>
    %36 = arith.addf %35, %34 : vector<8x16xf32>
    %37 = arith.divf %35, %36 : vector<8x16xf32>
    %38 = vector.extract_strided_slice %27 {offsets = [0, 16], sizes = [8, 16], strides = [1, 1]} : vector<8x64xf32> to vector<8x16xf32>
    %39 = arith.negf %38 : vector<8x16xf32>
    %40 = math.exp %39 : vector<8x16xf32>
    %cst_27 = arith.constant 1.000000e+00 : f32
    %41 = vector.broadcast %cst_27 : f32 to vector<8x16xf32>
    %42 = arith.addf %41, %40 : vector<8x16xf32>
    %43 = arith.divf %41, %42 : vector<8x16xf32>
    %44 = vector.extract_strided_slice %27 {offsets = [0, 32], sizes = [8, 16], strides = [1, 1]} : vector<8x64xf32> to vector<8x16xf32>
    %45 = math.tanh %44 : vector<8x16xf32>
    %46 = vector.extract_strided_slice %27 {offsets = [0, 48], sizes = [8, 16], strides = [1, 1]} : vector<8x64xf32> to vector<8x16xf32>
    %47 = arith.negf %46 : vector<8x16xf32>
    %48 = math.exp %47 : vector<8x16xf32>
    %cst_28 = arith.constant 1.000000e+00 : f32
    %49 = vector.broadcast %cst_28 : f32 to vector<8x16xf32>
    %50 = arith.addf %49, %48 : vector<8x16xf32>
    %51 = arith.divf %49, %50 : vector<8x16xf32>
    %52 = arith.mulf %43, %18 : vector<8x16xf32>
    %53 = arith.mulf %37, %45 : vector<8x16xf32>
    %54 = arith.addf %52, %53 : vector<8x16xf32>
    %55 = math.tanh %54 : vector<8x16xf32>
    %56 = arith.mulf %51, %55 : vector<8x16xf32>
    %57 = vector.extract_strided_slice %31 {offsets = [0, 0], sizes = [8, 16], strides = [1, 1]} : vector<8x64xf32> to vector<8x16xf32>
    %58 = arith.negf %57 : vector<8x16xf32>
    %59 = math.exp %58 : vector<8x16xf32>
    %cst_29 = arith.constant 1.000000e+00 : f32
    %60 = vector.broadcast %cst_29 : f32 to vector<8x16xf32>
    %61 = arith.addf %60, %59 : vector<8x16xf32>
    %62 = arith.divf %60, %61 : vector<8x16xf32>
    %63 = vector.extract_strided_slice %31 {offsets = [0, 16], sizes = [8, 16], strides = [1, 1]} : vector<8x64xf32> to vector<8x16xf32>
    %64 = arith.negf %63 : vector<8x16xf32>
    %65 = math.exp %64 : vector<8x16xf32>
    %cst_30 = arith.constant 1.000000e+00 : f32
    %66 = vector.broadcast %cst_30 : f32 to vector<8x16xf32>
    %67 = arith.addf %66, %65 : vector<8x16xf32>
    %68 = arith.divf %66, %67 : vector<8x16xf32>
    %69 = vector.extract_strided_slice %31 {offsets = [0, 32], sizes = [8, 16], strides = [1, 1]} : vector<8x64xf32> to vector<8x16xf32>
    %70 = math.tanh %69 : vector<8x16xf32>
    %71 = vector.extract_strided_slice %31 {offsets = [0, 48], sizes = [8, 16], strides = [1, 1]} : vector<8x64xf32> to vector<8x16xf32>
    %72 = arith.negf %71 : vector<8x16xf32>
    %73 = math.exp %72 : vector<8x16xf32>
    %cst_31 = arith.constant 1.000000e+00 : f32
    %74 = vector.broadcast %cst_31 : f32 to vector<8x16xf32>
    %75 = arith.addf %74, %73 : vector<8x16xf32>
    %76 = arith.divf %74, %75 : vector<8x16xf32>
    %77 = arith.mulf %68, %18 : vector<8x16xf32>
    %78 = arith.mulf %62, %70 : vector<8x16xf32>
    %79 = arith.addf %77, %78 : vector<8x16xf32>
    %80 = math.tanh %79 : vector<8x16xf32>
    %81 = arith.mulf %76, %80 : vector<8x16xf32>
    %82 = vector.broadcast %c0_i32 : i32 to vector<8x16xi32>
    %83 = arith.cmpi sgt, %17, %82 : vector<8x16xi32>
    %84 = vector.broadcast %19 : i32 to vector<8x16xi32>
    %85 = arith.cmpi sgt, %17, %84 : vector<8x16xi32>
    %cst_32 = arith.constant 0.000000e+00 : f32
    %86 = vector.broadcast %cst_32 : f32 to vector<8x16xf32>
    %87 = arith.select %83, %56, %86 : vector<8x16xi1>, vector<8x16xf32>
    %88 = arith.index_cast %21 : i32 to index
    %c0_33 = arith.constant 0 : index
    %89 = vector.load %arg8[%88, %c0_33] : memref<64x32xf32, #tpu.memory_space<vmem>>, vector<8x16xf32>
    tpu.vector_store %arg8[%88, %c0_33], %87 {strides = array<i32>} : memref<64x32xf32, #tpu.memory_space<vmem>>, vector<8x16xf32>,
    %cst_34 = arith.constant 0.000000e+00 : f32
    %90 = vector.broadcast %cst_34 : f32 to vector<8x16xf32>
    %91 = arith.select %85, %81, %90 : vector<8x16xi1>, vector<8x16xf32>
    %92 = arith.index_cast %23 : i32 to index
    %c16 = arith.constant 16 : index
    %93 = vector.load %arg8[%92, %c16] : memref<64x32xf32, #tpu.memory_space<vmem>>, vector<8x16xf32>
    tpu.vector_store %arg8[%92, %c16], %91 {strides = array<i32>} : memref<64x32xf32, #tpu.memory_space<vmem>>, vector<8x16xf32>,
    %94 = arith.select %83, %56, %18 : vector<8x16xi1>, vector<8x16xf32>
    %95 = arith.select %83, %54, %18 : vector<8x16xi1>, vector<8x16xf32>
    %96 = arith.select %85, %81, %18 : vector<8x16xi1>, vector<8x16xf32>
    %97 = arith.select %85, %79, %18 : vector<8x16xi1>, vector<8x16xf32>
    %c1_i32 = arith.constant 1 : i32
    %c7_i32_35 = arith.constant 7 : i32
    %98 = arith.subi %c7_i32_35, %c1_i32 : i32
    %c8_i32_36 = arith.constant 8 : i32
    %99 = arith.muli %c1_i32, %c8_i32_36 : i32
    %100 = tpu.assume_multiple %99, 8 : i32
    %c8_i32_37 = arith.constant 8 : i32
    %101 = arith.muli %98, %c8_i32_37 : i32
    %102 = tpu.assume_multiple %101, 8 : i32
    %103 = arith.index_cast %100 : i32 to index
    %c0_38 = arith.constant 0 : index
    %104 = vector.load %arg9[%103, %c0_38] : memref<64x64xf32, #tpu.memory_space<vmem>>, vector<8x64xf32>
    %cst_39 = arith.constant dense<0.000000e+00> : vector<8x64xf32>
    %105 = tpu.matmul %94, %13, %cst_39 {dimension_numbers = #tpu.dot_dimension_numbers<[1], [0], [0], [1], [0, 0, 1, 1], [], []>} : vector<8x16xf32>, vector<16x64xf32>, vector<8x64xf32> -> vector<8x64xf32>
    %106 = arith.addf %104, %105 : vector<8x64xf32>
    %107 = arith.index_cast %102 : i32 to index
    %c0_40 = arith.constant 0 : index
    %108 = vector.load %arg10[%107, %c0_40] : memref<64x64xf32, #tpu.memory_space<vmem>>, vector<8x64xf32>
    %cst_41 = arith.constant dense<0.000000e+00> : vector<8x64xf32>
    %109 = tpu.matmul %96, %14, %cst_41 {dimension_numbers = #tpu.dot_dimension_numbers<[1], [0], [0], [1], [0, 0, 1, 1], [], []>} : vector<8x16xf32>, vector<16x64xf32>, vector<8x64xf32> -> vector<8x64xf32>
    %110 = arith.addf %108, %109 : vector<8x64xf32>
    %111 = vector.extract_strided_slice %106 {offsets = [0, 0], sizes = [8, 16], strides = [1, 1]} : vector<8x64xf32> to vector<8x16xf32>
    %112 = arith.negf %111 : vector<8x16xf32>
    %113 = math.exp %112 : vector<8x16xf32>
    %cst_42 = arith.constant 1.000000e+00 : f32
    %114 = vector.broadcast %cst_42 : f32 to vector<8x16xf32>
    %115 = arith.addf %114, %113 : vector<8x16xf32>
    %116 = arith.divf %114, %115 : vector<8x16xf32>
    %117 = vector.extract_strided_slice %106 {offsets = [0, 16], sizes = [8, 16], strides = [1, 1]} : vector<8x64xf32> to vector<8x16xf32>
    %118 = arith.negf %117 : vector<8x16xf32>
    %119 = math.exp %118 : vector<8x16xf32>
    %cst_43 = arith.constant 1.000000e+00 : f32
    %120 = vector.broadcast %cst_43 : f32 to vector<8x16xf32>
    %121 = arith.addf %120, %119 : vector<8x16xf32>
    %122 = arith.divf %120, %121 : vector<8x16xf32>
    %123 = vector.extract_strided_slice %106 {offsets = [0, 32], sizes = [8, 16], strides = [1, 1]} : vector<8x64xf32> to vector<8x16xf32>
    %124 = math.tanh %123 : vector<8x16xf32>
    %125 = vector.extract_strided_slice %106 {offsets = [0, 48], sizes = [8, 16], strides = [1, 1]} : vector<8x64xf32> to vector<8x16xf32>
    %126 = arith.negf %125 : vector<8x16xf32>
    %127 = math.exp %126 : vector<8x16xf32>
    %cst_44 = arith.constant 1.000000e+00 : f32
    %128 = vector.broadcast %cst_44 : f32 to vector<8x16xf32>
    %129 = arith.addf %128, %127 : vector<8x16xf32>
    %130 = arith.divf %128, %129 : vector<8x16xf32>
    %131 = arith.mulf %122, %95 : vector<8x16xf32>
    %132 = arith.mulf %116, %124 : vector<8x16xf32>
    %133 = arith.addf %131, %132 : vector<8x16xf32>
    %134 = math.tanh %133 : vector<8x16xf32>
    %135 = arith.mulf %130, %134 : vector<8x16xf32>
    %136 = vector.extract_strided_slice %110 {offsets = [0, 0], sizes = [8, 16], strides = [1, 1]} : vector<8x64xf32> to vector<8x16xf32>
    %137 = arith.negf %136 : vector<8x16xf32>
    %138 = math.exp %137 : vector<8x16xf32>
    %cst_45 = arith.constant 1.000000e+00 : f32
    %139 = vector.broadcast %cst_45 : f32 to vector<8x16xf32>
    %140 = arith.addf %139, %138 : vector<8x16xf32>
    %141 = arith.divf %139, %140 : vector<8x16xf32>
    %142 = vector.extract_strided_slice %110 {offsets = [0, 16], sizes = [8, 16], strides = [1, 1]} : vector<8x64xf32> to vector<8x16xf32>
    %143 = arith.negf %142 : vector<8x16xf32>
    %144 = math.exp %143 : vector<8x16xf32>
    %cst_46 = arith.constant 1.000000e+00 : f32
    %145 = vector.broadcast %cst_46 : f32 to vector<8x16xf32>
    %146 = arith.addf %145, %144 : vector<8x16xf32>
    %147 = arith.divf %145, %146 : vector<8x16xf32>
    %148 = vector.extract_strided_slice %110 {offsets = [0, 32], sizes = [8, 16], strides = [1, 1]} : vector<8x64xf32> to vector<8x16xf32>
    %149 = math.tanh %148 : vector<8x16xf32>
    %150 = vector.extract_strided_slice %110 {offsets = [0, 48], sizes = [8, 16], strides = [1, 1]} : vector<8x64xf32> to vector<8x16xf32>
    %151 = arith.negf %150 : vector<8x16xf32>
    %152 = math.exp %151 : vector<8x16xf32>
    %cst_47 = arith.constant 1.000000e+00 : f32
    %153 = vector.broadcast %cst_47 : f32 to vector<8x16xf32>
    %154 = arith.addf %153, %152 : vector<8x16xf32>
    %155 = arith.divf %153, %154 : vector<8x16xf32>
    %156 = arith.mulf %147, %97 : vector<8x16xf32>
    %157 = arith.mulf %141, %149 : vector<8x16xf32>
    %158 = arith.addf %156, %157 : vector<8x16xf32>
    %159 = math.tanh %158 : vector<8x16xf32>
    %160 = arith.mulf %155, %159 : vector<8x16xf32>
    %161 = vector.broadcast %c1_i32 : i32 to vector<8x16xi32>
    %162 = arith.cmpi sgt, %17, %161 : vector<8x16xi32>
    %163 = vector.broadcast %98 : i32 to vector<8x16xi32>
    %164 = arith.cmpi sgt, %17, %163 : vector<8x16xi32>
    %cst_48 = arith.constant 0.000000e+00 : f32
    %165 = vector.broadcast %cst_48 : f32 to vector<8x16xf32>
    %166 = arith.select %162, %135, %165 : vector<8x16xi1>, vector<8x16xf32>
    %167 = arith.index_cast %100 : i32 to index
    %c0_49 = arith.constant 0 : index
    %168 = vector.load %arg8[%167, %c0_49] : memref<64x32xf32, #tpu.memory_space<vmem>>, vector<8x16xf32>
    tpu.vector_store %arg8[%167, %c0_49], %166 {strides = array<i32>} : memref<64x32xf32, #tpu.memory_space<vmem>>, vector<8x16xf32>,
    %cst_50 = arith.constant 0.000000e+00 : f32
    %169 = vector.broadcast %cst_50 : f32 to vector<8x16xf32>
    %170 = arith.select %164, %160, %169 : vector<8x16xi1>, vector<8x16xf32>
    %171 = arith.index_cast %102 : i32 to index
    %c16_51 = arith.constant 16 : index
    %172 = vector.load %arg8[%171, %c16_51] : memref<64x32xf32, #tpu.memory_space<vmem>>, vector<8x16xf32>
    tpu.vector_store %arg8[%171, %c16_51], %170 {strides = array<i32>} : memref<64x32xf32, #tpu.memory_space<vmem>>, vector<8x16xf32>,
    %173 = arith.select %162, %135, %94 : vector<8x16xi1>, vector<8x16xf32>
    %174 = arith.select %162, %133, %95 : vector<8x16xi1>, vector<8x16xf32>
    %175 = arith.select %164, %160, %96 : vector<8x16xi1>, vector<8x16xf32>
    %176 = arith.select %164, %158, %97 : vector<8x16xi1>, vector<8x16xf32>
    %c2_i32 = arith.constant 2 : i32
    %c7_i32_52 = arith.constant 7 : i32
    %177 = arith.subi %c7_i32_52, %c2_i32 : i32
    %c8_i32_53 = arith.constant 8 : i32
    %178 = arith.muli %c2_i32, %c8_i32_53 : i32
    %179 = tpu.assume_multiple %178, 8 : i32
    %c8_i32_54 = arith.constant 8 : i32
    %180 = arith.muli %177, %c8_i32_54 : i32
    %181 = tpu.assume_multiple %180, 8 : i32
    %182 = arith.index_cast %179 : i32 to index
    %c0_55 = arith.constant 0 : index
    %183 = vector.load %arg9[%182, %c0_55] : memref<64x64xf32, #tpu.memory_space<vmem>>, vector<8x64xf32>
    %cst_56 = arith.constant dense<0.000000e+00> : vector<8x64xf32>
    %184 = tpu.matmul %173, %13, %cst_56 {dimension_numbers = #tpu.dot_dimension_numbers<[1], [0], [0], [1], [0, 0, 1, 1], [], []>} : vector<8x16xf32>, vector<16x64xf32>, vector<8x64xf32> -> vector<8x64xf32>
    %185 = arith.addf %183, %184 : vector<8x64xf32>
    %186 = arith.index_cast %181 : i32 to index
    %c0_57 = arith.constant 0 : index
    %187 = vector.load %arg10[%186, %c0_57] : memref<64x64xf32, #tpu.memory_space<vmem>>, vector<8x64xf32>
    %cst_58 = arith.constant dense<0.000000e+00> : vector<8x64xf32>
    %188 = tpu.matmul %175, %14, %cst_58 {dimension_numbers = #tpu.dot_dimension_numbers<[1], [0], [0], [1], [0, 0, 1, 1], [], []>} : vector<8x16xf32>, vector<16x64xf32>, vector<8x64xf32> -> vector<8x64xf32>
    %189 = arith.addf %187, %188 : vector<8x64xf32>
    %190 = vector.extract_strided_slice %185 {offsets = [0, 0], sizes = [8, 16], strides = [1, 1]} : vector<8x64xf32> to vector<8x16xf32>
    %191 = arith.negf %190 : vector<8x16xf32>
    %192 = math.exp %191 : vector<8x16xf32>
    %cst_59 = arith.constant 1.000000e+00 : f32
    %193 = vector.broadcast %cst_59 : f32 to vector<8x16xf32>
    %194 = arith.addf %193, %192 : vector<8x16xf32>
    %195 = arith.divf %193, %194 : vector<8x16xf32>
    %196 = vector.extract_strided_slice %185 {offsets = [0, 16], sizes = [8, 16], strides = [1, 1]} : vector<8x64xf32> to vector<8x16xf32>
    %197 = arith.negf %196 : vector<8x16xf32>
    %198 = math.exp %197 : vector<8x16xf32>
    %cst_60 = arith.constant 1.000000e+00 : f32
    %199 = vector.broadcast %cst_60 : f32 to vector<8x16xf32>
    %200 = arith.addf %199, %198 : vector<8x16xf32>
    %201 = arith.divf %199, %200 : vector<8x16xf32>
    %202 = vector.extract_strided_slice %185 {offsets = [0, 32], sizes = [8, 16], strides = [1, 1]} : vector<8x64xf32> to vector<8x16xf32>
    %203 = math.tanh %202 : vector<8x16xf32>
    %204 = vector.extract_strided_slice %185 {offsets = [0, 48], sizes = [8, 16], strides = [1, 1]} : vector<8x64xf32> to vector<8x16xf32>
    %205 = arith.negf %204 : vector<8x16xf32>
    %206 = math.exp %205 : vector<8x16xf32>
    %cst_61 = arith.constant 1.000000e+00 : f32
    %207 = vector.broadcast %cst_61 : f32 to vector<8x16xf32>
    %208 = arith.addf %207, %206 : vector<8x16xf32>
    %209 = arith.divf %207, %208 : vector<8x16xf32>
    %210 = arith.mulf %201, %174 : vector<8x16xf32>
    %211 = arith.mulf %195, %203 : vector<8x16xf32>
    %212 = arith.addf %210, %211 : vector<8x16xf32>
    %213 = math.tanh %212 : vector<8x16xf32>
    %214 = arith.mulf %209, %213 : vector<8x16xf32>
    %215 = vector.extract_strided_slice %189 {offsets = [0, 0], sizes = [8, 16], strides = [1, 1]} : vector<8x64xf32> to vector<8x16xf32>
    %216 = arith.negf %215 : vector<8x16xf32>
    %217 = math.exp %216 : vector<8x16xf32>
    %cst_62 = arith.constant 1.000000e+00 : f32
    %218 = vector.broadcast %cst_62 : f32 to vector<8x16xf32>
    %219 = arith.addf %218, %217 : vector<8x16xf32>
    %220 = arith.divf %218, %219 : vector<8x16xf32>
    %221 = vector.extract_strided_slice %189 {offsets = [0, 16], sizes = [8, 16], strides = [1, 1]} : vector<8x64xf32> to vector<8x16xf32>
    %222 = arith.negf %221 : vector<8x16xf32>
    %223 = math.exp %222 : vector<8x16xf32>
    %cst_63 = arith.constant 1.000000e+00 : f32
    %224 = vector.broadcast %cst_63 : f32 to vector<8x16xf32>
    %225 = arith.addf %224, %223 : vector<8x16xf32>
    %226 = arith.divf %224, %225 : vector<8x16xf32>
    %227 = vector.extract_strided_slice %189 {offsets = [0, 32], sizes = [8, 16], strides = [1, 1]} : vector<8x64xf32> to vector<8x16xf32>
    %228 = math.tanh %227 : vector<8x16xf32>
    %229 = vector.extract_strided_slice %189 {offsets = [0, 48], sizes = [8, 16], strides = [1, 1]} : vector<8x64xf32> to vector<8x16xf32>
    %230 = arith.negf %229 : vector<8x16xf32>
    %231 = math.exp %230 : vector<8x16xf32>
    %cst_64 = arith.constant 1.000000e+00 : f32
    %232 = vector.broadcast %cst_64 : f32 to vector<8x16xf32>
    %233 = arith.addf %232, %231 : vector<8x16xf32>
    %234 = arith.divf %232, %233 : vector<8x16xf32>
    %235 = arith.mulf %226, %176 : vector<8x16xf32>
    %236 = arith.mulf %220, %228 : vector<8x16xf32>
    %237 = arith.addf %235, %236 : vector<8x16xf32>
    %238 = math.tanh %237 : vector<8x16xf32>
    %239 = arith.mulf %234, %238 : vector<8x16xf32>
    %240 = vector.broadcast %c2_i32 : i32 to vector<8x16xi32>
    %241 = arith.cmpi sgt, %17, %240 : vector<8x16xi32>
    %242 = vector.broadcast %177 : i32 to vector<8x16xi32>
    %243 = arith.cmpi sgt, %17, %242 : vector<8x16xi32>
    %cst_65 = arith.constant 0.000000e+00 : f32
    %244 = vector.broadcast %cst_65 : f32 to vector<8x16xf32>
    %245 = arith.select %241, %214, %244 : vector<8x16xi1>, vector<8x16xf32>
    %246 = arith.index_cast %179 : i32 to index
    %c0_66 = arith.constant 0 : index
    %247 = vector.load %arg8[%246, %c0_66] : memref<64x32xf32, #tpu.memory_space<vmem>>, vector<8x16xf32>
    tpu.vector_store %arg8[%246, %c0_66], %245 {strides = array<i32>} : memref<64x32xf32, #tpu.memory_space<vmem>>, vector<8x16xf32>,
    %cst_67 = arith.constant 0.000000e+00 : f32
    %248 = vector.broadcast %cst_67 : f32 to vector<8x16xf32>
    %249 = arith.select %243, %239, %248 : vector<8x16xi1>, vector<8x16xf32>
    %250 = arith.index_cast %181 : i32 to index
    %c16_68 = arith.constant 16 : index
    %251 = vector.load %arg8[%250, %c16_68] : memref<64x32xf32, #tpu.memory_space<vmem>>, vector<8x16xf32>
    tpu.vector_store %arg8[%250, %c16_68], %249 {strides = array<i32>} : memref<64x32xf32, #tpu.memory_space<vmem>>, vector<8x16xf32>,
    %252 = arith.select %241, %214, %173 : vector<8x16xi1>, vector<8x16xf32>
    %253 = arith.select %241, %212, %174 : vector<8x16xi1>, vector<8x16xf32>
    %254 = arith.select %243, %239, %175 : vector<8x16xi1>, vector<8x16xf32>
    %255 = arith.select %243, %237, %176 : vector<8x16xi1>, vector<8x16xf32>
    %c3_i32 = arith.constant 3 : i32
    %c7_i32_69 = arith.constant 7 : i32
    %256 = arith.subi %c7_i32_69, %c3_i32 : i32
    %c8_i32_70 = arith.constant 8 : i32
    %257 = arith.muli %c3_i32, %c8_i32_70 : i32
    %258 = tpu.assume_multiple %257, 8 : i32
    %c8_i32_71 = arith.constant 8 : i32
    %259 = arith.muli %256, %c8_i32_71 : i32
    %260 = tpu.assume_multiple %259, 8 : i32
    %261 = arith.index_cast %258 : i32 to index
    %c0_72 = arith.constant 0 : index
    %262 = vector.load %arg9[%261, %c0_72] : memref<64x64xf32, #tpu.memory_space<vmem>>, vector<8x64xf32>
    %cst_73 = arith.constant dense<0.000000e+00> : vector<8x64xf32>
    %263 = tpu.matmul %252, %13, %cst_73 {dimension_numbers = #tpu.dot_dimension_numbers<[1], [0], [0], [1], [0, 0, 1, 1], [], []>} : vector<8x16xf32>, vector<16x64xf32>, vector<8x64xf32> -> vector<8x64xf32>
    %264 = arith.addf %262, %263 : vector<8x64xf32>
    %265 = arith.index_cast %260 : i32 to index
    %c0_74 = arith.constant 0 : index
    %266 = vector.load %arg10[%265, %c0_74] : memref<64x64xf32, #tpu.memory_space<vmem>>, vector<8x64xf32>
    %cst_75 = arith.constant dense<0.000000e+00> : vector<8x64xf32>
    %267 = tpu.matmul %254, %14, %cst_75 {dimension_numbers = #tpu.dot_dimension_numbers<[1], [0], [0], [1], [0, 0, 1, 1], [], []>} : vector<8x16xf32>, vector<16x64xf32>, vector<8x64xf32> -> vector<8x64xf32>
    %268 = arith.addf %266, %267 : vector<8x64xf32>
    %269 = vector.extract_strided_slice %264 {offsets = [0, 0], sizes = [8, 16], strides = [1, 1]} : vector<8x64xf32> to vector<8x16xf32>
    %270 = arith.negf %269 : vector<8x16xf32>
    %271 = math.exp %270 : vector<8x16xf32>
    %cst_76 = arith.constant 1.000000e+00 : f32
    %272 = vector.broadcast %cst_76 : f32 to vector<8x16xf32>
    %273 = arith.addf %272, %271 : vector<8x16xf32>
    %274 = arith.divf %272, %273 : vector<8x16xf32>
    %275 = vector.extract_strided_slice %264 {offsets = [0, 16], sizes = [8, 16], strides = [1, 1]} : vector<8x64xf32> to vector<8x16xf32>
    %276 = arith.negf %275 : vector<8x16xf32>
    %277 = math.exp %276 : vector<8x16xf32>
    %cst_77 = arith.constant 1.000000e+00 : f32
    %278 = vector.broadcast %cst_77 : f32 to vector<8x16xf32>
    %279 = arith.addf %278, %277 : vector<8x16xf32>
    %280 = arith.divf %278, %279 : vector<8x16xf32>
    %281 = vector.extract_strided_slice %264 {offsets = [0, 32], sizes = [8, 16], strides = [1, 1]} : vector<8x64xf32> to vector<8x16xf32>
    %282 = math.tanh %281 : vector<8x16xf32>
    %283 = vector.extract_strided_slice %264 {offsets = [0, 48], sizes = [8, 16], strides = [1, 1]} : vector<8x64xf32> to vector<8x16xf32>
    %284 = arith.negf %283 : vector<8x16xf32>
    %285 = math.exp %284 : vector<8x16xf32>
    %cst_78 = arith.constant 1.000000e+00 : f32
    %286 = vector.broadcast %cst_78 : f32 to vector<8x16xf32>
    %287 = arith.addf %286, %285 : vector<8x16xf32>
    %288 = arith.divf %286, %287 : vector<8x16xf32>
    %289 = arith.mulf %280, %253 : vector<8x16xf32>
    %290 = arith.mulf %274, %282 : vector<8x16xf32>
    %291 = arith.addf %289, %290 : vector<8x16xf32>
    %292 = math.tanh %291 : vector<8x16xf32>
    %293 = arith.mulf %288, %292 : vector<8x16xf32>
    %294 = vector.extract_strided_slice %268 {offsets = [0, 0], sizes = [8, 16], strides = [1, 1]} : vector<8x64xf32> to vector<8x16xf32>
    %295 = arith.negf %294 : vector<8x16xf32>
    %296 = math.exp %295 : vector<8x16xf32>
    %cst_79 = arith.constant 1.000000e+00 : f32
    %297 = vector.broadcast %cst_79 : f32 to vector<8x16xf32>
    %298 = arith.addf %297, %296 : vector<8x16xf32>
    %299 = arith.divf %297, %298 : vector<8x16xf32>
    %300 = vector.extract_strided_slice %268 {offsets = [0, 16], sizes = [8, 16], strides = [1, 1]} : vector<8x64xf32> to vector<8x16xf32>
    %301 = arith.negf %300 : vector<8x16xf32>
    %302 = math.exp %301 : vector<8x16xf32>
    %cst_80 = arith.constant 1.000000e+00 : f32
    %303 = vector.broadcast %cst_80 : f32 to vector<8x16xf32>
    %304 = arith.addf %303, %302 : vector<8x16xf32>
    %305 = arith.divf %303, %304 : vector<8x16xf32>
    %306 = vector.extract_strided_slice %268 {offsets = [0, 32], sizes = [8, 16], strides = [1, 1]} : vector<8x64xf32> to vector<8x16xf32>
    %307 = math.tanh %306 : vector<8x16xf32>
    %308 = vector.extract_strided_slice %268 {offsets = [0, 48], sizes = [8, 16], strides = [1, 1]} : vector<8x64xf32> to vector<8x16xf32>
    %309 = arith.negf %308 : vector<8x16xf32>
    %310 = math.exp %309 : vector<8x16xf32>
    %cst_81 = arith.constant 1.000000e+00 : f32
    %311 = vector.broadcast %cst_81 : f32 to vector<8x16xf32>
    %312 = arith.addf %311, %310 : vector<8x16xf32>
    %313 = arith.divf %311, %312 : vector<8x16xf32>
    %314 = arith.mulf %305, %255 : vector<8x16xf32>
    %315 = arith.mulf %299, %307 : vector<8x16xf32>
    %316 = arith.addf %314, %315 : vector<8x16xf32>
    %317 = math.tanh %316 : vector<8x16xf32>
    %318 = arith.mulf %313, %317 : vector<8x16xf32>
    %319 = vector.broadcast %c3_i32 : i32 to vector<8x16xi32>
    %320 = arith.cmpi sgt, %17, %319 : vector<8x16xi32>
    %321 = vector.broadcast %256 : i32 to vector<8x16xi32>
    %322 = arith.cmpi sgt, %17, %321 : vector<8x16xi32>
    %cst_82 = arith.constant 0.000000e+00 : f32
    %323 = vector.broadcast %cst_82 : f32 to vector<8x16xf32>
    %324 = arith.select %320, %293, %323 : vector<8x16xi1>, vector<8x16xf32>
    %325 = arith.index_cast %258 : i32 to index
    %c0_83 = arith.constant 0 : index
    %326 = vector.load %arg8[%325, %c0_83] : memref<64x32xf32, #tpu.memory_space<vmem>>, vector<8x16xf32>
    tpu.vector_store %arg8[%325, %c0_83], %324 {strides = array<i32>} : memref<64x32xf32, #tpu.memory_space<vmem>>, vector<8x16xf32>,
    %cst_84 = arith.constant 0.000000e+00 : f32
    %327 = vector.broadcast %cst_84 : f32 to vector<8x16xf32>
    %328 = arith.select %322, %318, %327 : vector<8x16xi1>, vector<8x16xf32>
    %329 = arith.index_cast %260 : i32 to index
    %c16_85 = arith.constant 16 : index
    %330 = vector.load %arg8[%329, %c16_85] : memref<64x32xf32, #tpu.memory_space<vmem>>, vector<8x16xf32>
    tpu.vector_store %arg8[%329, %c16_85], %328 {strides = array<i32>} : memref<64x32xf32, #tpu.memory_space<vmem>>, vector<8x16xf32>,
    %331 = arith.select %320, %293, %252 : vector<8x16xi1>, vector<8x16xf32>
    %332 = arith.select %320, %291, %253 : vector<8x16xi1>, vector<8x16xf32>
    %333 = arith.select %322, %318, %254 : vector<8x16xi1>, vector<8x16xf32>
    %334 = arith.select %322, %316, %255 : vector<8x16xi1>, vector<8x16xf32>
    %c4_i32 = arith.constant 4 : i32
    %c7_i32_86 = arith.constant 7 : i32
    %335 = arith.subi %c7_i32_86, %c4_i32 : i32
    %c8_i32_87 = arith.constant 8 : i32
    %336 = arith.muli %c4_i32, %c8_i32_87 : i32
    %337 = tpu.assume_multiple %336, 8 : i32
    %c8_i32_88 = arith.constant 8 : i32
    %338 = arith.muli %335, %c8_i32_88 : i32
    %339 = tpu.assume_multiple %338, 8 : i32
    %340 = arith.index_cast %337 : i32 to index
    %c0_89 = arith.constant 0 : index
    %341 = vector.load %arg9[%340, %c0_89] : memref<64x64xf32, #tpu.memory_space<vmem>>, vector<8x64xf32>
    %cst_90 = arith.constant dense<0.000000e+00> : vector<8x64xf32>
    %342 = tpu.matmul %331, %13, %cst_90 {dimension_numbers = #tpu.dot_dimension_numbers<[1], [0], [0], [1], [0, 0, 1, 1], [], []>} : vector<8x16xf32>, vector<16x64xf32>, vector<8x64xf32> -> vector<8x64xf32>
    %343 = arith.addf %341, %342 : vector<8x64xf32>
    %344 = arith.index_cast %339 : i32 to index
    %c0_91 = arith.constant 0 : index
    %345 = vector.load %arg10[%344, %c0_91] : memref<64x64xf32, #tpu.memory_space<vmem>>, vector<8x64xf32>
    %cst_92 = arith.constant dense<0.000000e+00> : vector<8x64xf32>
    %346 = tpu.matmul %333, %14, %cst_92 {dimension_numbers = #tpu.dot_dimension_numbers<[1], [0], [0], [1], [0, 0, 1, 1], [], []>} : vector<8x16xf32>, vector<16x64xf32>, vector<8x64xf32> -> vector<8x64xf32>
    %347 = arith.addf %345, %346 : vector<8x64xf32>
    %348 = vector.extract_strided_slice %343 {offsets = [0, 0], sizes = [8, 16], strides = [1, 1]} : vector<8x64xf32> to vector<8x16xf32>
    %349 = arith.negf %348 : vector<8x16xf32>
    %350 = math.exp %349 : vector<8x16xf32>
    %cst_93 = arith.constant 1.000000e+00 : f32
    %351 = vector.broadcast %cst_93 : f32 to vector<8x16xf32>
    %352 = arith.addf %351, %350 : vector<8x16xf32>
    %353 = arith.divf %351, %352 : vector<8x16xf32>
    %354 = vector.extract_strided_slice %343 {offsets = [0, 16], sizes = [8, 16], strides = [1, 1]} : vector<8x64xf32> to vector<8x16xf32>
    %355 = arith.negf %354 : vector<8x16xf32>
    %356 = math.exp %355 : vector<8x16xf32>
    %cst_94 = arith.constant 1.000000e+00 : f32
    %357 = vector.broadcast %cst_94 : f32 to vector<8x16xf32>
    %358 = arith.addf %357, %356 : vector<8x16xf32>
    %359 = arith.divf %357, %358 : vector<8x16xf32>
    %360 = vector.extract_strided_slice %343 {offsets = [0, 32], sizes = [8, 16], strides = [1, 1]} : vector<8x64xf32> to vector<8x16xf32>
    %361 = math.tanh %360 : vector<8x16xf32>
    %362 = vector.extract_strided_slice %343 {offsets = [0, 48], sizes = [8, 16], strides = [1, 1]} : vector<8x64xf32> to vector<8x16xf32>
    %363 = arith.negf %362 : vector<8x16xf32>
    %364 = math.exp %363 : vector<8x16xf32>
    %cst_95 = arith.constant 1.000000e+00 : f32
    %365 = vector.broadcast %cst_95 : f32 to vector<8x16xf32>
    %366 = arith.addf %365, %364 : vector<8x16xf32>
    %367 = arith.divf %365, %366 : vector<8x16xf32>
    %368 = arith.mulf %359, %332 : vector<8x16xf32>
    %369 = arith.mulf %353, %361 : vector<8x16xf32>
    %370 = arith.addf %368, %369 : vector<8x16xf32>
    %371 = math.tanh %370 : vector<8x16xf32>
    %372 = arith.mulf %367, %371 : vector<8x16xf32>
    %373 = vector.extract_strided_slice %347 {offsets = [0, 0], sizes = [8, 16], strides = [1, 1]} : vector<8x64xf32> to vector<8x16xf32>
    %374 = arith.negf %373 : vector<8x16xf32>
    %375 = math.exp %374 : vector<8x16xf32>
    %cst_96 = arith.constant 1.000000e+00 : f32
    %376 = vector.broadcast %cst_96 : f32 to vector<8x16xf32>
    %377 = arith.addf %376, %375 : vector<8x16xf32>
    %378 = arith.divf %376, %377 : vector<8x16xf32>
    %379 = vector.extract_strided_slice %347 {offsets = [0, 16], sizes = [8, 16], strides = [1, 1]} : vector<8x64xf32> to vector<8x16xf32>
    %380 = arith.negf %379 : vector<8x16xf32>
    %381 = math.exp %380 : vector<8x16xf32>
    %cst_97 = arith.constant 1.000000e+00 : f32
    %382 = vector.broadcast %cst_97 : f32 to vector<8x16xf32>
    %383 = arith.addf %382, %381 : vector<8x16xf32>
    %384 = arith.divf %382, %383 : vector<8x16xf32>
    %385 = vector.extract_strided_slice %347 {offsets = [0, 32], sizes = [8, 16], strides = [1, 1]} : vector<8x64xf32> to vector<8x16xf32>
    %386 = math.tanh %385 : vector<8x16xf32>
    %387 = vector.extract_strided_slice %347 {offsets = [0, 48], sizes = [8, 16], strides = [1, 1]} : vector<8x64xf32> to vector<8x16xf32>
    %388 = arith.negf %387 : vector<8x16xf32>
    %389 = math.exp %388 : vector<8x16xf32>
    %cst_98 = arith.constant 1.000000e+00 : f32
    %390 = vector.broadcast %cst_98 : f32 to vector<8x16xf32>
    %391 = arith.addf %390, %389 : vector<8x16xf32>
    %392 = arith.divf %390, %391 : vector<8x16xf32>
    %393 = arith.mulf %384, %334 : vector<8x16xf32>
    %394 = arith.mulf %378, %386 : vector<8x16xf32>
    %395 = arith.addf %393, %394 : vector<8x16xf32>
    %396 = math.tanh %395 : vector<8x16xf32>
    %397 = arith.mulf %392, %396 : vector<8x16xf32>
    %398 = vector.broadcast %c4_i32 : i32 to vector<8x16xi32>
    %399 = arith.cmpi sgt, %17, %398 : vector<8x16xi32>
    %400 = vector.broadcast %335 : i32 to vector<8x16xi32>
    %401 = arith.cmpi sgt, %17, %400 : vector<8x16xi32>
    %cst_99 = arith.constant 0.000000e+00 : f32
    %402 = vector.broadcast %cst_99 : f32 to vector<8x16xf32>
    %403 = arith.select %399, %372, %402 : vector<8x16xi1>, vector<8x16xf32>
    %404 = arith.index_cast %337 : i32 to index
    %c0_100 = arith.constant 0 : index
    %405 = vector.load %arg8[%404, %c0_100] : memref<64x32xf32, #tpu.memory_space<vmem>>, vector<8x16xf32>
    tpu.vector_store %arg8[%404, %c0_100], %403 {strides = array<i32>} : memref<64x32xf32, #tpu.memory_space<vmem>>, vector<8x16xf32>,
    %cst_101 = arith.constant 0.000000e+00 : f32
    %406 = vector.broadcast %cst_101 : f32 to vector<8x16xf32>
    %407 = arith.select %401, %397, %406 : vector<8x16xi1>, vector<8x16xf32>
    %408 = arith.index_cast %339 : i32 to index
    %c16_102 = arith.constant 16 : index
    %409 = vector.load %arg8[%408, %c16_102] : memref<64x32xf32, #tpu.memory_space<vmem>>, vector<8x16xf32>
    tpu.vector_store %arg8[%408, %c16_102], %407 {strides = array<i32>} : memref<64x32xf32, #tpu.memory_space<vmem>>, vector<8x16xf32>,
    %410 = arith.select %399, %372, %331 : vector<8x16xi1>, vector<8x16xf32>
    %411 = arith.select %399, %370, %332 : vector<8x16xi1>, vector<8x16xf32>
    %412 = arith.select %401, %397, %333 : vector<8x16xi1>, vector<8x16xf32>
    %413 = arith.select %401, %395, %334 : vector<8x16xi1>, vector<8x16xf32>
    %c5_i32 = arith.constant 5 : i32
    %c7_i32_103 = arith.constant 7 : i32
    %414 = arith.subi %c7_i32_103, %c5_i32 : i32
    %c8_i32_104 = arith.constant 8 : i32
    %415 = arith.muli %c5_i32, %c8_i32_104 : i32
    %416 = tpu.assume_multiple %415, 8 : i32
    %c8_i32_105 = arith.constant 8 : i32
    %417 = arith.muli %414, %c8_i32_105 : i32
    %418 = tpu.assume_multiple %417, 8 : i32
    %419 = arith.index_cast %416 : i32 to index
    %c0_106 = arith.constant 0 : index
    %420 = vector.load %arg9[%419, %c0_106] : memref<64x64xf32, #tpu.memory_space<vmem>>, vector<8x64xf32>
    %cst_107 = arith.constant dense<0.000000e+00> : vector<8x64xf32>
    %421 = tpu.matmul %410, %13, %cst_107 {dimension_numbers = #tpu.dot_dimension_numbers<[1], [0], [0], [1], [0, 0, 1, 1], [], []>} : vector<8x16xf32>, vector<16x64xf32>, vector<8x64xf32> -> vector<8x64xf32>
    %422 = arith.addf %420, %421 : vector<8x64xf32>
    %423 = arith.index_cast %418 : i32 to index
    %c0_108 = arith.constant 0 : index
    %424 = vector.load %arg10[%423, %c0_108] : memref<64x64xf32, #tpu.memory_space<vmem>>, vector<8x64xf32>
    %cst_109 = arith.constant dense<0.000000e+00> : vector<8x64xf32>
    %425 = tpu.matmul %412, %14, %cst_109 {dimension_numbers = #tpu.dot_dimension_numbers<[1], [0], [0], [1], [0, 0, 1, 1], [], []>} : vector<8x16xf32>, vector<16x64xf32>, vector<8x64xf32> -> vector<8x64xf32>
    %426 = arith.addf %424, %425 : vector<8x64xf32>
    %427 = vector.extract_strided_slice %422 {offsets = [0, 0], sizes = [8, 16], strides = [1, 1]} : vector<8x64xf32> to vector<8x16xf32>
    %428 = arith.negf %427 : vector<8x16xf32>
    %429 = math.exp %428 : vector<8x16xf32>
    %cst_110 = arith.constant 1.000000e+00 : f32
    %430 = vector.broadcast %cst_110 : f32 to vector<8x16xf32>
    %431 = arith.addf %430, %429 : vector<8x16xf32>
    %432 = arith.divf %430, %431 : vector<8x16xf32>
    %433 = vector.extract_strided_slice %422 {offsets = [0, 16], sizes = [8, 16], strides = [1, 1]} : vector<8x64xf32> to vector<8x16xf32>
    %434 = arith.negf %433 : vector<8x16xf32>
    %435 = math.exp %434 : vector<8x16xf32>
    %cst_111 = arith.constant 1.000000e+00 : f32
    %436 = vector.broadcast %cst_111 : f32 to vector<8x16xf32>
    %437 = arith.addf %436, %435 : vector<8x16xf32>
    %438 = arith.divf %436, %437 : vector<8x16xf32>
    %439 = vector.extract_strided_slice %422 {offsets = [0, 32], sizes = [8, 16], strides = [1, 1]} : vector<8x64xf32> to vector<8x16xf32>
    %440 = math.tanh %439 : vector<8x16xf32>
    %441 = vector.extract_strided_slice %422 {offsets = [0, 48], sizes = [8, 16], strides = [1, 1]} : vector<8x64xf32> to vector<8x16xf32>
    %442 = arith.negf %441 : vector<8x16xf32>
    %443 = math.exp %442 : vector<8x16xf32>
    %cst_112 = arith.constant 1.000000e+00 : f32
    %444 = vector.broadcast %cst_112 : f32 to vector<8x16xf32>
    %445 = arith.addf %444, %443 : vector<8x16xf32>
    %446 = arith.divf %444, %445 : vector<8x16xf32>
    %447 = arith.mulf %438, %411 : vector<8x16xf32>
    %448 = arith.mulf %432, %440 : vector<8x16xf32>
    %449 = arith.addf %447, %448 : vector<8x16xf32>
    %450 = math.tanh %449 : vector<8x16xf32>
    %451 = arith.mulf %446, %450 : vector<8x16xf32>
    %452 = vector.extract_strided_slice %426 {offsets = [0, 0], sizes = [8, 16], strides = [1, 1]} : vector<8x64xf32> to vector<8x16xf32>
    %453 = arith.negf %452 : vector<8x16xf32>
    %454 = math.exp %453 : vector<8x16xf32>
    %cst_113 = arith.constant 1.000000e+00 : f32
    %455 = vector.broadcast %cst_113 : f32 to vector<8x16xf32>
    %456 = arith.addf %455, %454 : vector<8x16xf32>
    %457 = arith.divf %455, %456 : vector<8x16xf32>
    %458 = vector.extract_strided_slice %426 {offsets = [0, 16], sizes = [8, 16], strides = [1, 1]} : vector<8x64xf32> to vector<8x16xf32>
    %459 = arith.negf %458 : vector<8x16xf32>
    %460 = math.exp %459 : vector<8x16xf32>
    %cst_114 = arith.constant 1.000000e+00 : f32
    %461 = vector.broadcast %cst_114 : f32 to vector<8x16xf32>
    %462 = arith.addf %461, %460 : vector<8x16xf32>
    %463 = arith.divf %461, %462 : vector<8x16xf32>
    %464 = vector.extract_strided_slice %426 {offsets = [0, 32], sizes = [8, 16], strides = [1, 1]} : vector<8x64xf32> to vector<8x16xf32>
    %465 = math.tanh %464 : vector<8x16xf32>
    %466 = vector.extract_strided_slice %426 {offsets = [0, 48], sizes = [8, 16], strides = [1, 1]} : vector<8x64xf32> to vector<8x16xf32>
    %467 = arith.negf %466 : vector<8x16xf32>
    %468 = math.exp %467 : vector<8x16xf32>
    %cst_115 = arith.constant 1.000000e+00 : f32
    %469 = vector.broadcast %cst_115 : f32 to vector<8x16xf32>
    %470 = arith.addf %469, %468 : vector<8x16xf32>
    %471 = arith.divf %469, %470 : vector<8x16xf32>
    %472 = arith.mulf %463, %413 : vector<8x16xf32>
    %473 = arith.mulf %457, %465 : vector<8x16xf32>
    %474 = arith.addf %472, %473 : vector<8x16xf32>
    %475 = math.tanh %474 : vector<8x16xf32>
    %476 = arith.mulf %471, %475 : vector<8x16xf32>
    %477 = vector.broadcast %c5_i32 : i32 to vector<8x16xi32>
    %478 = arith.cmpi sgt, %17, %477 : vector<8x16xi32>
    %479 = vector.broadcast %414 : i32 to vector<8x16xi32>
    %480 = arith.cmpi sgt, %17, %479 : vector<8x16xi32>
    %cst_116 = arith.constant 0.000000e+00 : f32
    %481 = vector.broadcast %cst_116 : f32 to vector<8x16xf32>
    %482 = arith.select %478, %451, %481 : vector<8x16xi1>, vector<8x16xf32>
    %483 = arith.index_cast %416 : i32 to index
    %c0_117 = arith.constant 0 : index
    %484 = vector.load %arg8[%483, %c0_117] : memref<64x32xf32, #tpu.memory_space<vmem>>, vector<8x16xf32>
    tpu.vector_store %arg8[%483, %c0_117], %482 {strides = array<i32>} : memref<64x32xf32, #tpu.memory_space<vmem>>, vector<8x16xf32>,
    %cst_118 = arith.constant 0.000000e+00 : f32
    %485 = vector.broadcast %cst_118 : f32 to vector<8x16xf32>
    %486 = arith.select %480, %476, %485 : vector<8x16xi1>, vector<8x16xf32>
    %487 = arith.index_cast %418 : i32 to index
    %c16_119 = arith.constant 16 : index
    %488 = vector.load %arg8[%487, %c16_119] : memref<64x32xf32, #tpu.memory_space<vmem>>, vector<8x16xf32>
    tpu.vector_store %arg8[%487, %c16_119], %486 {strides = array<i32>} : memref<64x32xf32, #tpu.memory_space<vmem>>, vector<8x16xf32>,
    %489 = arith.select %478, %451, %410 : vector<8x16xi1>, vector<8x16xf32>
    %490 = arith.select %478, %449, %411 : vector<8x16xi1>, vector<8x16xf32>
    %491 = arith.select %480, %476, %412 : vector<8x16xi1>, vector<8x16xf32>
    %492 = arith.select %480, %474, %413 : vector<8x16xi1>, vector<8x16xf32>
    %c6_i32 = arith.constant 6 : i32
    %c7_i32_120 = arith.constant 7 : i32
    %493 = arith.subi %c7_i32_120, %c6_i32 : i32
    %c8_i32_121 = arith.constant 8 : i32
    %494 = arith.muli %c6_i32, %c8_i32_121 : i32
    %495 = tpu.assume_multiple %494, 8 : i32
    %c8_i32_122 = arith.constant 8 : i32
    %496 = arith.muli %493, %c8_i32_122 : i32
    %497 = tpu.assume_multiple %496, 8 : i32
    %498 = arith.index_cast %495 : i32 to index
    %c0_123 = arith.constant 0 : index
    %499 = vector.load %arg9[%498, %c0_123] : memref<64x64xf32, #tpu.memory_space<vmem>>, vector<8x64xf32>
    %cst_124 = arith.constant dense<0.000000e+00> : vector<8x64xf32>
    %500 = tpu.matmul %489, %13, %cst_124 {dimension_numbers = #tpu.dot_dimension_numbers<[1], [0], [0], [1], [0, 0, 1, 1], [], []>} : vector<8x16xf32>, vector<16x64xf32>, vector<8x64xf32> -> vector<8x64xf32>
    %501 = arith.addf %499, %500 : vector<8x64xf32>
    %502 = arith.index_cast %497 : i32 to index
    %c0_125 = arith.constant 0 : index
    %503 = vector.load %arg10[%502, %c0_125] : memref<64x64xf32, #tpu.memory_space<vmem>>, vector<8x64xf32>
    %cst_126 = arith.constant dense<0.000000e+00> : vector<8x64xf32>
    %504 = tpu.matmul %491, %14, %cst_126 {dimension_numbers = #tpu.dot_dimension_numbers<[1], [0], [0], [1], [0, 0, 1, 1], [], []>} : vector<8x16xf32>, vector<16x64xf32>, vector<8x64xf32> -> vector<8x64xf32>
    %505 = arith.addf %503, %504 : vector<8x64xf32>
    %506 = vector.extract_strided_slice %501 {offsets = [0, 0], sizes = [8, 16], strides = [1, 1]} : vector<8x64xf32> to vector<8x16xf32>
    %507 = arith.negf %506 : vector<8x16xf32>
    %508 = math.exp %507 : vector<8x16xf32>
    %cst_127 = arith.constant 1.000000e+00 : f32
    %509 = vector.broadcast %cst_127 : f32 to vector<8x16xf32>
    %510 = arith.addf %509, %508 : vector<8x16xf32>
    %511 = arith.divf %509, %510 : vector<8x16xf32>
    %512 = vector.extract_strided_slice %501 {offsets = [0, 16], sizes = [8, 16], strides = [1, 1]} : vector<8x64xf32> to vector<8x16xf32>
    %513 = arith.negf %512 : vector<8x16xf32>
    %514 = math.exp %513 : vector<8x16xf32>
    %cst_128 = arith.constant 1.000000e+00 : f32
    %515 = vector.broadcast %cst_128 : f32 to vector<8x16xf32>
    %516 = arith.addf %515, %514 : vector<8x16xf32>
    %517 = arith.divf %515, %516 : vector<8x16xf32>
    %518 = vector.extract_strided_slice %501 {offsets = [0, 32], sizes = [8, 16], strides = [1, 1]} : vector<8x64xf32> to vector<8x16xf32>
    %519 = math.tanh %518 : vector<8x16xf32>
    %520 = vector.extract_strided_slice %501 {offsets = [0, 48], sizes = [8, 16], strides = [1, 1]} : vector<8x64xf32> to vector<8x16xf32>
    %521 = arith.negf %520 : vector<8x16xf32>
    %522 = math.exp %521 : vector<8x16xf32>
    %cst_129 = arith.constant 1.000000e+00 : f32
    %523 = vector.broadcast %cst_129 : f32 to vector<8x16xf32>
    %524 = arith.addf %523, %522 : vector<8x16xf32>
    %525 = arith.divf %523, %524 : vector<8x16xf32>
    %526 = arith.mulf %517, %490 : vector<8x16xf32>
    %527 = arith.mulf %511, %519 : vector<8x16xf32>
    %528 = arith.addf %526, %527 : vector<8x16xf32>
    %529 = math.tanh %528 : vector<8x16xf32>
    %530 = arith.mulf %525, %529 : vector<8x16xf32>
    %531 = vector.extract_strided_slice %505 {offsets = [0, 0], sizes = [8, 16], strides = [1, 1]} : vector<8x64xf32> to vector<8x16xf32>
    %532 = arith.negf %531 : vector<8x16xf32>
    %533 = math.exp %532 : vector<8x16xf32>
    %cst_130 = arith.constant 1.000000e+00 : f32
    %534 = vector.broadcast %cst_130 : f32 to vector<8x16xf32>
    %535 = arith.addf %534, %533 : vector<8x16xf32>
    %536 = arith.divf %534, %535 : vector<8x16xf32>
    %537 = vector.extract_strided_slice %505 {offsets = [0, 16], sizes = [8, 16], strides = [1, 1]} : vector<8x64xf32> to vector<8x16xf32>
    %538 = arith.negf %537 : vector<8x16xf32>
    %539 = math.exp %538 : vector<8x16xf32>
    %cst_131 = arith.constant 1.000000e+00 : f32
    %540 = vector.broadcast %cst_131 : f32 to vector<8x16xf32>
    %541 = arith.addf %540, %539 : vector<8x16xf32>
    %542 = arith.divf %540, %541 : vector<8x16xf32>
    %543 = vector.extract_strided_slice %505 {offsets = [0, 32], sizes = [8, 16], strides = [1, 1]} : vector<8x64xf32> to vector<8x16xf32>
    %544 = math.tanh %543 : vector<8x16xf32>
    %545 = vector.extract_strided_slice %505 {offsets = [0, 48], sizes = [8, 16], strides = [1, 1]} : vector<8x64xf32> to vector<8x16xf32>
    %546 = arith.negf %545 : vector<8x16xf32>
    %547 = math.exp %546 : vector<8x16xf32>
    %cst_132 = arith.constant 1.000000e+00 : f32
    %548 = vector.broadcast %cst_132 : f32 to vector<8x16xf32>
    %549 = arith.addf %548, %547 : vector<8x16xf32>
    %550 = arith.divf %548, %549 : vector<8x16xf32>
    %551 = arith.mulf %542, %492 : vector<8x16xf32>
    %552 = arith.mulf %536, %544 : vector<8x16xf32>
    %553 = arith.addf %551, %552 : vector<8x16xf32>
    %554 = math.tanh %553 : vector<8x16xf32>
    %555 = arith.mulf %550, %554 : vector<8x16xf32>
    %556 = vector.broadcast %c6_i32 : i32 to vector<8x16xi32>
    %557 = arith.cmpi sgt, %17, %556 : vector<8x16xi32>
    %558 = vector.broadcast %493 : i32 to vector<8x16xi32>
    %559 = arith.cmpi sgt, %17, %558 : vector<8x16xi32>
    %cst_133 = arith.constant 0.000000e+00 : f32
    %560 = vector.broadcast %cst_133 : f32 to vector<8x16xf32>
    %561 = arith.select %557, %530, %560 : vector<8x16xi1>, vector<8x16xf32>
    %562 = arith.index_cast %495 : i32 to index
    %c0_134 = arith.constant 0 : index
    %563 = vector.load %arg8[%562, %c0_134] : memref<64x32xf32, #tpu.memory_space<vmem>>, vector<8x16xf32>
    tpu.vector_store %arg8[%562, %c0_134], %561 {strides = array<i32>} : memref<64x32xf32, #tpu.memory_space<vmem>>, vector<8x16xf32>,
    %cst_135 = arith.constant 0.000000e+00 : f32
    %564 = vector.broadcast %cst_135 : f32 to vector<8x16xf32>
    %565 = arith.select %559, %555, %564 : vector<8x16xi1>, vector<8x16xf32>
    %566 = arith.index_cast %497 : i32 to index
    %c16_136 = arith.constant 16 : index
    %567 = vector.load %arg8[%566, %c16_136] : memref<64x32xf32, #tpu.memory_space<vmem>>, vector<8x16xf32>
    tpu.vector_store %arg8[%566, %c16_136], %565 {strides = array<i32>} : memref<64x32xf32, #tpu.memory_space<vmem>>, vector<8x16xf32>,
    %568 = arith.select %557, %530, %489 : vector<8x16xi1>, vector<8x16xf32>
    %569 = arith.select %557, %528, %490 : vector<8x16xi1>, vector<8x16xf32>
    %570 = arith.select %559, %555, %491 : vector<8x16xi1>, vector<8x16xf32>
    %571 = arith.select %559, %553, %492 : vector<8x16xi1>, vector<8x16xf32>
    %c7_i32_137 = arith.constant 7 : i32
    %c7_i32_138 = arith.constant 7 : i32
    %572 = arith.subi %c7_i32_138, %c7_i32_137 : i32
    %c8_i32_139 = arith.constant 8 : i32
    %573 = arith.muli %c7_i32_137, %c8_i32_139 : i32
    %574 = tpu.assume_multiple %573, 8 : i32
    %c8_i32_140 = arith.constant 8 : i32
    %575 = arith.muli %572, %c8_i32_140 : i32
    %576 = tpu.assume_multiple %575, 8 : i32
    %577 = arith.index_cast %574 : i32 to index
    %c0_141 = arith.constant 0 : index
    %578 = vector.load %arg9[%577, %c0_141] : memref<64x64xf32, #tpu.memory_space<vmem>>, vector<8x64xf32>
    %cst_142 = arith.constant dense<0.000000e+00> : vector<8x64xf32>
    %579 = tpu.matmul %568, %13, %cst_142 {dimension_numbers = #tpu.dot_dimension_numbers<[1], [0], [0], [1], [0, 0, 1, 1], [], []>} : vector<8x16xf32>, vector<16x64xf32>, vector<8x64xf32> -> vector<8x64xf32>
    %580 = arith.addf %578, %579 : vector<8x64xf32>
    %581 = arith.index_cast %576 : i32 to index
    %c0_143 = arith.constant 0 : index
    %582 = vector.load %arg10[%581, %c0_143] : memref<64x64xf32, #tpu.memory_space<vmem>>, vector<8x64xf32>
    %cst_144 = arith.constant dense<0.000000e+00> : vector<8x64xf32>
    %583 = tpu.matmul %570, %14, %cst_144 {dimension_numbers = #tpu.dot_dimension_numbers<[1], [0], [0], [1], [0, 0, 1, 1], [], []>} : vector<8x16xf32>, vector<16x64xf32>, vector<8x64xf32> -> vector<8x64xf32>
    %584 = arith.addf %582, %583 : vector<8x64xf32>
    %585 = vector.extract_strided_slice %580 {offsets = [0, 0], sizes = [8, 16], strides = [1, 1]} : vector<8x64xf32> to vector<8x16xf32>
    %586 = arith.negf %585 : vector<8x16xf32>
    %587 = math.exp %586 : vector<8x16xf32>
    %cst_145 = arith.constant 1.000000e+00 : f32
    %588 = vector.broadcast %cst_145 : f32 to vector<8x16xf32>
    %589 = arith.addf %588, %587 : vector<8x16xf32>
    %590 = arith.divf %588, %589 : vector<8x16xf32>
    %591 = vector.extract_strided_slice %580 {offsets = [0, 16], sizes = [8, 16], strides = [1, 1]} : vector<8x64xf32> to vector<8x16xf32>
    %592 = arith.negf %591 : vector<8x16xf32>
    %593 = math.exp %592 : vector<8x16xf32>
    %cst_146 = arith.constant 1.000000e+00 : f32
    %594 = vector.broadcast %cst_146 : f32 to vector<8x16xf32>
    %595 = arith.addf %594, %593 : vector<8x16xf32>
    %596 = arith.divf %594, %595 : vector<8x16xf32>
    %597 = vector.extract_strided_slice %580 {offsets = [0, 32], sizes = [8, 16], strides = [1, 1]} : vector<8x64xf32> to vector<8x16xf32>
    %598 = math.tanh %597 : vector<8x16xf32>
    %599 = vector.extract_strided_slice %580 {offsets = [0, 48], sizes = [8, 16], strides = [1, 1]} : vector<8x64xf32> to vector<8x16xf32>
    %600 = arith.negf %599 : vector<8x16xf32>
    %601 = math.exp %600 : vector<8x16xf32>
    %cst_147 = arith.constant 1.000000e+00 : f32
    %602 = vector.broadcast %cst_147 : f32 to vector<8x16xf32>
    %603 = arith.addf %602, %601 : vector<8x16xf32>
    %604 = arith.divf %602, %603 : vector<8x16xf32>
    %605 = arith.mulf %596, %569 : vector<8x16xf32>
    %606 = arith.mulf %590, %598 : vector<8x16xf32>
    %607 = arith.addf %605, %606 : vector<8x16xf32>
    %608 = math.tanh %607 : vector<8x16xf32>
    %609 = arith.mulf %604, %608 : vector<8x16xf32>
    %610 = vector.extract_strided_slice %584 {offsets = [0, 0], sizes = [8, 16], strides = [1, 1]} : vector<8x64xf32> to vector<8x16xf32>
    %611 = arith.negf %610 : vector<8x16xf32>
    %612 = math.exp %611 : vector<8x16xf32>
    %cst_148 = arith.constant 1.000000e+00 : f32
    %613 = vector.broadcast %cst_148 : f32 to vector<8x16xf32>
    %614 = arith.addf %613, %612 : vector<8x16xf32>
    %615 = arith.divf %613, %614 : vector<8x16xf32>
    %616 = vector.extract_strided_slice %584 {offsets = [0, 16], sizes = [8, 16], strides = [1, 1]} : vector<8x64xf32> to vector<8x16xf32>
    %617 = arith.negf %616 : vector<8x16xf32>
    %618 = math.exp %617 : vector<8x16xf32>
    %cst_149 = arith.constant 1.000000e+00 : f32
    %619 = vector.broadcast %cst_149 : f32 to vector<8x16xf32>
    %620 = arith.addf %619, %618 : vector<8x16xf32>
    %621 = arith.divf %619, %620 : vector<8x16xf32>
    %622 = vector.extract_strided_slice %584 {offsets = [0, 32], sizes = [8, 16], strides = [1, 1]} : vector<8x64xf32> to vector<8x16xf32>
    %623 = math.tanh %622 : vector<8x16xf32>
    %624 = vector.extract_strided_slice %584 {offsets = [0, 48], sizes = [8, 16], strides = [1, 1]} : vector<8x64xf32> to vector<8x16xf32>
    %625 = arith.negf %624 : vector<8x16xf32>
    %626 = math.exp %625 : vector<8x16xf32>
    %cst_150 = arith.constant 1.000000e+00 : f32
    %627 = vector.broadcast %cst_150 : f32 to vector<8x16xf32>
    %628 = arith.addf %627, %626 : vector<8x16xf32>
    %629 = arith.divf %627, %628 : vector<8x16xf32>
    %630 = arith.mulf %621, %571 : vector<8x16xf32>
    %631 = arith.mulf %615, %623 : vector<8x16xf32>
    %632 = arith.addf %630, %631 : vector<8x16xf32>
    %633 = math.tanh %632 : vector<8x16xf32>
    %634 = arith.mulf %629, %633 : vector<8x16xf32>
    %635 = vector.broadcast %c7_i32_137 : i32 to vector<8x16xi32>
    %636 = arith.cmpi sgt, %17, %635 : vector<8x16xi32>
    %637 = vector.broadcast %572 : i32 to vector<8x16xi32>
    %638 = arith.cmpi sgt, %17, %637 : vector<8x16xi32>
    %cst_151 = arith.constant 0.000000e+00 : f32
    %639 = vector.broadcast %cst_151 : f32 to vector<8x16xf32>
    %640 = arith.select %636, %609, %639 : vector<8x16xi1>, vector<8x16xf32>
    %641 = arith.index_cast %574 : i32 to index
    %c0_152 = arith.constant 0 : index
    %642 = vector.load %arg8[%641, %c0_152] : memref<64x32xf32, #tpu.memory_space<vmem>>, vector<8x16xf32>
    tpu.vector_store %arg8[%641, %c0_152], %640 {strides = array<i32>} : memref<64x32xf32, #tpu.memory_space<vmem>>, vector<8x16xf32>,
    %cst_153 = arith.constant 0.000000e+00 : f32
    %643 = vector.broadcast %cst_153 : f32 to vector<8x16xf32>
    %644 = arith.select %638, %634, %643 : vector<8x16xi1>, vector<8x16xf32>
    %645 = arith.index_cast %576 : i32 to index
    %c16_154 = arith.constant 16 : index
    %646 = vector.load %arg8[%645, %c16_154] : memref<64x32xf32, #tpu.memory_space<vmem>>, vector<8x16xf32>
    tpu.vector_store %arg8[%645, %c16_154], %644 {strides = array<i32>} : memref<64x32xf32, #tpu.memory_space<vmem>>, vector<8x16xf32>,
    %647 = arith.select %636, %609, %568 : vector<8x16xi1>, vector<8x16xf32>
    %648 = arith.select %636, %607, %569 : vector<8x16xi1>, vector<8x16xf32>
    %649 = arith.select %638, %634, %570 : vector<8x16xi1>, vector<8x16xf32>
    %650 = arith.select %638, %632, %571 : vector<8x16xi1>, vector<8x16xf32>
    %c8_i32_155 = arith.constant 8 : i32
    return
  }
}

</mosaic_0001>

<bundles_post_ra>
// kernel: tpu_custom_call.1
= control target key start
LH: loop header
LB: loop body
LE: loop exit
PB: predicated region body
PF: predicated region fallthrough
CT: control target
= control target key end

     0   :  { %vm48_vm0 = vcmask 261120   ;;  %v2568_v19 = vmov 0.0|0.0   ;;  %vm2569_vm1 = vmmov 0   ;;  %v2570_v27 = vmov 0.0   ;;  %s2575_s23 = smov 80   ;;  %s3210_s2 = inlined_call_operand.vmem [shape: f32[32,64], index: 2, kind: input, shape index: {}]   ;;  %s3211_s5 = inlined_call_operand.vmem [shape: f32[32,64], index: 5, kind: input, shape index: {}]   ;;  %s3212_s0 = inlined_call_operand.vmem [shape: f32[64,32], index: 0, kind: input, shape index: {}]   ;;  %s3213_s3 = inlined_call_operand.vmem [shape: f32[16,64], index: 3, kind: input, shape index: {}]   ;;  %s3214_s6 = inlined_call_operand.vmem [shape: f32[16,64], index: 6, kind: input, shape index: {}]   ;;  %s3215_s4 = inlined_call_operand.vmem [shape: f32[1,64], index: 4, kind: input, shape index: {}]   ;;  %s3216_s7 = inlined_call_operand.vmem [shape: f32[1,64], index: 7, kind: input, shape index: {}]   ;;  %s3217_s1 = inlined_call_operand.vmem [shape: s32[8,1], index: 1, kind: input, shape index: {}]   ;;  %s3218_s8 = inlined_call_operand.vmem [shape: f32[64,32], index: 8, kind: output, shape index: {}]  }
   0x1   :  { %v37_v0 = vld [vmem:[%s3210_s2] sm:$0xff]  ;;  %v38_v1 = vld [vmem:[%s3210_s2 + $0x8] sm:$0xff]  ;;  %v39_v5 = vld [vmem:[%s3210_s2 + $0x10] sm:$0xff]  ;;  %v2571_v28 = vmov 0   ;;  %vm178_vm2 = vcmask 523264   ;;  %vm320_vm5 = vcmask 130048  }
   0x2   :  { %v187_v2 = vld [vmem:[%s3211_s5] sm:$0xff]  ;;  %v2367_v3 = vpack.c.bf16 %v38_v1, %v37_v0  ;;  %v188_v4 = vld [vmem:[%s3211_s5 + $0x8] sm:$0xff]  ;;  %v40_v6 = vld [vmem:[%s3210_s2 + $0x18] sm:$0xff]  ;;  %2439 = vset.pattern.permute.xlu0 %v2571_v28  ;;  %s2573_s2 = smov 16   ;;  %vm530_vm12 = vcmask 261248  }
   0x3   :  { %v2375_v7 = vpack.c.bf16 %v188_v4, %v187_v2  ;;  %v2371_v8 = vpack.c.bf16 %v40_v6, %v39_v5  ;;  %v189_v9 = vld [vmem:[%s3211_s5 + $0x10] sm:$0xff]  ;;  %v190_v10 = vld [vmem:[%s3211_s5 + $0x18] sm:$0xff]  ;;  %v29_v11 = vld [vmem:[%s3212_s0] sm:$0xff] }
   0x4   :  { %2368 = vmatprep.subr.bf16.mxu0 %v2367_v3  ;;  %v2379_v12 = vpack.c.bf16 %v190_v10, %v189_v9  ;;  %2223 = vmatprep.mubr.msk.f32.mxu0 %vm48_vm0, %v29_v11  ;;  %v311_v13 = vld [vmem:[%s3213_s3] sm:$0xff]  ;;  %v312_v14 = vld [vmem:[%s3213_s3 + $0x8] sm:$0xff]  ;;  %v31_v20 = vld [vmem:[%s3212_s0 + $0x10] sm:$0xff] }
   0x5   :  { %2376 = vmatprep.subr.bf16.mxu1 %v2375_v7  ;;  %2370 = vmatpush3.bf16.msra.mxu0 %v2367_v3  ;;  %v313_v15 = vld [vmem:[%s3214_s6] sm:$0xff]  ;;  %v314_v16 = vld [vmem:[%s3214_s6 + $0x8] sm:$0xff]  ;;  %v2665_v18 = vpack.c.bf16 %v312_v14, %v311_v13  ;;  %v32_v22 = vld [vmem:[%s3212_s0 + $0x18] sm:$0xff] }
   0x6   :  { %2378 = vmatpush3.bf16.msra.mxu1 %v2375_v7  ;;  %2372 = vmatprep.subr.bf16.mxu0 %v2371_v8  ;;  %v30_v17 = vld [vmem:[%s3212_s0 + $0x8] sm:$0xff]  ;;  %v2672_v21 = vpack.c.bf16 %v314_v16, %v313_v15  ;;  %v33_v23 = vld [vmem:[%s3212_s0 + $0x20] sm:$0xff]  ;;  %v35_v25 = vld [vmem:[%s3212_s0 + $0x30] sm:$0xff] }
   0x7   :  { %2380 = vmatprep.subr.bf16.mxu1 %v2379_v12  ;;  %2243 = vmatprep.mubr.msk.f32.mxu1 %vm48_vm0, %v29_v11  ;;  %v34_v24 = vld [vmem:[%s3212_s0 + $0x28] sm:$0xff]  ;;  %v36_v26 = vld [vmem:[%s3212_s0 + $0x38] sm:$0xff]  ;;  %v2081_v29 = vld [vmem:[%s3215_s4] ss:$0 sm:$0xff]  ;;  %s2572_s4 = smov 96  }
   0x8   :  { %v2090_v30 = vld [vmem:[%s3216_s7] ss:$0 sm:$0xff] }
   0x9   :  { %2374 = vmatpush3.bf16.msra.mxu0 %v2371_v8  ;;  %v315_v9 = vld [vmem:[%s3217_s1] sm:$0xff]  ;;  %s2574_s1 = smov 32  }
   0xa   :  { %2382 = vmatpush3.bf16.msra.mxu1 %v2379_v12  ;;  %2383 = vmatprep.subr.bf16.mxu0 %v2568_v19 }
   0xb   :  { %2386 = vmatprep.subr.bf16.mxu1 %v2568_v19 }
   0xc   :  { %2224 = vmatmul.mubr.msk.f32.vlgmr.msra.gmra.mrb[0].mxu0 %vm48_vm0, %v30_v17 }
   0xd   :  { %2244 = vmatmul.mubr.msk.f32.vlgmr.msra.gmra.mrb[0].mxu1 %vm48_vm0, %v30_v17  ;;  %2385 = vmatpush3.bf16.msra.mxu0 %v2665_v18 }
   0xe   :  { %2226 = vmatprep.mubr.msk.f32.mxu0 %vm48_vm0, %v31_v20  ;;  %2246 = vmatprep.mubr.msk.f32.mxu1 %vm48_vm0, %v31_v20 }
   0xf   :  { %2388 = vmatpush3.bf16.msra.mxu1 %v2672_v21  ;;  %2389 = vmatprep.subr.bf16.mxu0 %v2568_v19 }
  0x10   :  { %2227 = vmatmul.mubr.msk.f32.gmra.mrb[2].mxu0 %vm48_vm0, %v32_v22  ;;  %2392 = vmatprep.subr.bf16.mxu1 %v2568_v19 }
  0x11   :  { %2247 = vmatmul.mubr.msk.f32.gmra.mrb[2].mxu1 %vm48_vm0, %v32_v22  ;;  %2229 = vmatprep.mubr.msk.f32.mxu0 %vm48_vm0, %v33_v23 }
  0x12   :  { %2249 = vmatprep.mubr.msk.f32.mxu1 %vm48_vm0, %v33_v23 }
  0x14   :  { %2230 = vmatmul.mubr.msk.f32.gmra.mrb[4].mxu0 %vm48_vm0, %v34_v24 }
  0x15   :  { %2250 = vmatmul.mubr.msk.f32.gmra.mrb[4].mxu1 %vm48_vm0, %v34_v24  ;;  %2232 = vmatprep.mubr.msk.f32.mxu0 %vm48_vm0, %v35_v25 }
  0x16   :  { %2252 = vmatprep.mubr.msk.f32.mxu1 %vm48_vm0, %v35_v25 }
  0x18   :  { %2233 = vmatmul.mubr.msk.f32.gmra.mrb[6].mxu0 %vm48_vm0, %v36_v26 }
  0x19   :  { %2253 = vmatmul.mubr.msk.f32.gmra.mrb[6].mxu1 %vm48_vm0, %v36_v26  ;;  %2259 = vmatprep.mubr.msk.f32.mxu0 %vm2569_vm1, %v2570_v27 }
  0x1a   :  { %2266 = vmatprep.mubr.msk.f32.mxu1 %vm2569_vm1, %v2570_v27 }
  0x1c   :  { %2260 = vmatmul.mubr.f32.vlgmr.msra.gmra.mrb[8].mxu0 %v2570_v27 }
  0x1d   :  { %2267 = vmatmul.mubr.f32.vlgmr.msra.gmra.mrb[8].mxu1 %v2570_v27  ;;  %2391 = vmatpush3.bf16.msra.mxu0 %v2665_v18 }
  0x1e   :  { %2273 = vmatprep.mubr.msk.f32.mxu0 %vm2569_vm1, %v2570_v27  ;;  %2394 = vmatpush3.bf16.msra.mxu1 %v2672_v21 }
  0x1f   :  { %2280 = vmatprep.mubr.msk.f32.mxu1 %vm2569_vm1, %v2570_v27  ;;  %2395 = vmatprep.subr.bf16.mxu0 %v2568_v19 }
  0x20   :  { %2398 = vmatprep.subr.bf16.mxu1 %v2568_v19 }
  0xdf   :  { %v2225_v31 = vpop.f32.mrb[0].mxu0 }
  0xe0   :  { %v2245_v32 = vpop.f32.mrb[0].mxu1  ;;  %v145_v33 = vadd.f32 %v2225_v31, %v2081_v29  ;;  %v139_v34 = vpop.f32.mrb[1].mxu0 }
  0xe1   :  { %v270_v35 = vadd.f32 %v2245_v32, %v2090_v30  ;;  %v264_v36 = vpop.f32.mrb[1].mxu1  ;;  %v140_v37 = vadd.f32 %v2081_v29, %v139_v34 }
  0xe2   :  { %180 = vst.msk [vmem:[#allocation2 + $0x8] sm:$0xff] %vm178_vm2, %v145_v33  ;;  %v265_v38 = vadd.f32 %v2090_v30, %v264_v36 }
  0xe3   :  { %304 = vst.msk [vmem:[#allocation3 + $0x8] sm:$0xff] %vm178_vm2, %v270_v35  ;;  %179 = vst.msk [vmem:[#allocation2] sm:$0xff] %vm178_vm2, %v140_v37  ;;  %v2228_v39 = vpop.f32.mrb[2].mxu0 }
  0xe4   :  { %303 = vst.msk [vmem:[#allocation3] sm:$0xff] %vm178_vm2, %v265_v38  ;;  %v2248_v40 = vpop.f32.mrb[2].mxu1  ;;  %v155_v41 = vadd.f32 %v2228_v39, %v2081_v29  ;;  %v149_v42 = vpop.f32.mrb[3].mxu0 }
  0xe5   :  { %v280_v43 = vadd.f32 %v2248_v40, %v2090_v30  ;;  %v274_v44 = vpop.f32.mrb[3].mxu1  ;;  %v150_v45 = vadd.f32 %v2081_v29, %v149_v42 }
  0xe6   :  { %182 = vst.msk [vmem:[#allocation2 + $0x18] sm:$0xff] %vm178_vm2, %v155_v41  ;;  %v275_v46 = vadd.f32 %v2090_v30, %v274_v44 }
  0xe7   :  { %306 = vst.msk [vmem:[#allocation3 + $0x18] sm:$0xff] %vm178_vm2, %v280_v43  ;;  %181 = vst.msk [vmem:[#allocation2 + $0x10] sm:$0xff] %vm178_vm2, %v150_v45  ;;  %v2231_v47 = vpop.f32.mrb[4].mxu0 }
  0xe8   :  { %305 = vst.msk [vmem:[#allocation3 + $0x10] sm:$0xff] %vm178_vm2, %v275_v46  ;;  %v2251_v48 = vpop.f32.mrb[4].mxu1  ;;  %v165_v49 = vadd.f32 %v2231_v47, %v2081_v29  ;;  %v159_v50 = vpop.f32.mrb[5].mxu0 }
  0xe9   :  { %v290_v51 = vadd.f32 %v2251_v48, %v2090_v30  ;;  %v284_v52 = vpop.f32.mrb[5].mxu1  ;;  %v160_v53 = vadd.f32 %v2081_v29, %v159_v50  ;;  %v535_v43 = vld [vmem:[#allocation2 + $0x8] sm:$0xff] }
  0xea   :  { %184 = vst.msk [vmem:[#allocation2 + $0x28] sm:$0xff] %vm178_vm2, %v165_v49  ;;  %v285_v54 = vadd.f32 %v2090_v30, %v284_v52  ;;  %v319_v63 = vld [vmem:[#allocation2] sm:$0xff] }
  0xeb   :  { %308 = vst.msk [vmem:[#allocation3 + $0x28] sm:$0xff] %vm178_vm2, %v290_v51  ;;  %183 = vst.msk [vmem:[#allocation2 + $0x20] sm:$0xff] %vm178_vm2, %v160_v53  ;;  %v2234_v55 = vpop.f32.mrb[6].mxu0 }
  0xec   :  { %307 = vst.msk [vmem:[#allocation3 + $0x20] sm:$0xff] %vm178_vm2, %v285_v54  ;;  %v2254_v56 = vpop.f32.mrb[6].mxu1  ;;  %v175_v57 = vadd.f32 %v2234_v55, %v2081_v29  ;;  %v169_v58 = vpop.f32.mrb[7].mxu0 }
  0xed   :  { %v300_v59 = vadd.f32 %v2254_v56, %v2090_v30  ;;  %v294_v60 = vpop.f32.mrb[7].mxu1  ;;  %v170_v61 = vadd.f32 %v2081_v29, %v169_v58 }
  0xee   :  { %186 = vst.msk [vmem:[#allocation2 + $0x38] sm:$0xff] %vm178_vm2, %v175_v57  ;;  %v295_v62 = vadd.f32 %v2090_v30, %v294_v60 }
  0xef   :  { %310 = vst.msk [vmem:[#allocation3 + $0x38] sm:$0xff] %vm178_vm2, %v300_v59  ;;  %185 = vst.msk [vmem:[#allocation2 + $0x30] sm:$0xff] %vm178_vm2, %v170_v61  ;;  %v390_v0 = vpop.f32.mrb[8].mxu0 }
  0xf0   :  { %309 = vst.msk [vmem:[#allocation3 + $0x30] sm:$0xff] %vm178_vm2, %v295_v62  ;;  %v394_v1 = vadd.f32 %v390_v0, %v319_v63  ;;  %v2261_v2 = vpop.f32.mrb[9].mxu0  ;;  %v463_v3 = vpop.f32.mrb[8].mxu1 }
  0xf1   :  { %v2268_v4 = vpop.f32.mrb[9].mxu1 }
  0xf2   :  { %2440 = vtanh.f32 %v394_v1  ;;  %v2099_v10 = vmul.f32 -1.442695, %v394_v1 }
  0xf6   :  { %v396_v5 = vld [vmem:[#allocation3 + $0x38] sm:$0xff] }
  0xf7   :  { %v467_v6 = vadd.f32 %v463_v3, %v396_v5  ;;  %v610_v47 = vld [vmem:[#allocation3 + $0x30] sm:$0xff] }
  0xf9   :  { %2442 = vtanh.f32 %v467_v6  ;;  %v2100_v11 = vmul.f32 -1.442695, %v467_v6 }
  0xfa   :  { %2444 = vpow2.f32 %v2099_v10 }
  0xfb   :  { %2446 = vpow2.f32 %v2100_v11 }
  0xfc   :  { %v2441_v7 = vpop.eup %2440 }
  0xfd   :  { %477 = vrot.lane.b32.xlu0 %v2441_v7, %s2572_s4 }
 0x103   :  { %v2443_v8 = vpop.eup %2442 }
 0x104   :  { %501 = vrot.lane.b32.xlu0 %v2443_v8, %s2572_s4  ;;  %v2445_v12 = vpop.eup %2444 }
 0x105   :  { %v471_v13 = vadd.f32 1.0, %v2445_v12  ;;  %v2447_v14 = vpop.eup %2446 }
 0x106   :  { %v495_v15 = vadd.f32 1.0, %v2447_v14 }
 0x107   :  { %2448 = vrcp.f32 %v471_v13 }
 0x108   :  { %317 = vperm.xlu0 %2439, %v315_v9   ;;  %2450 = vrcp.f32 %v495_v15 }
 0x111   :  { %v2449_v16 = vpop.eup %2448 }
 0x112   :  { %v2451_v22 = vpop.eup %2450  ;;  %v475_v25 = vmul.f32 0.0, %v2449_v16 }
 0x113   :  { %v499_v29 = vmul.f32 0.0, %v2451_v22 }
 0x16f   :  { %v478_v17 = vpop.permute.xlu0 %477 }
 0x170   :  { %v480_v20 = vmul.f32 %v2449_v16, %v478_v17 }
 0x172   :  { %482 = vrot.lane.b32.xlu1 %v480_v20, %s2573_s2 }
 0x176   :  { %v502_v23 = vpop.permute.xlu0 %501 }
 0x177   :  { %v504_v24 = vmul.f32 %v2451_v22, %v502_v23 }
 0x179   :  { %506 = vrot.lane.b32.xlu1 %v504_v24, %s2573_s2 }
 0x187   :  { %v2758_v34 = vpop.permute.xlu0 %317 }
 0x188   :  { %vm516_vm3 = vcmp.gt.s32.totalorder %v2758_v34, 0  ;;  %vm517_vm4 = vcmp.gt.s32.totalorder %v2758_v34, 7  ;;  %vm734_vm6 = vcmp.gt.s32.totalorder %v2758_v34, 1  ;;  %vm735_vm7 = vcmp.gt.s32.totalorder %v2758_v34, 6 }
 0x189   :  { %vm958_vm8 = vcmp.gt.s32.totalorder %v2758_v34, 2  ;;  %vm959_vm9 = vcmp.gt.s32.totalorder %v2758_v34, 5  ;;  %vm1182_vm10 = vcmp.gt.s32.totalorder %v2758_v34, 3  ;;  %vm1183_vm11 = vcmp.gt.s32.totalorder %v2758_v34, 4 }
 0x1e4   :  { %v483_v26 = vpop.permute.xlu1 %482 }
 0x1e5   :  { %v2750_v28 = vadd.f32 %v483_v26, %v475_v25  ;;  %v833_v26 = vld [vmem:[#allocation3 + $0x28] sm:$0xff] }
 0x1e7   :  { %2452 = vtanh.f32 %v2750_v28  ;;  %v2795_v1 = vsel %vm516_vm3, %v2750_v28, 0.0 }
 0x1eb   :  { %v507_v30 = vpop.permute.xlu1 %506 }
 0x1ec   :  { %v2753_v31 = vadd.f32 %v507_v30, %v499_v29 }
 0x1ee   :  { %2454 = vtanh.f32 %v2753_v31  ;;  %v2804_v5 = vsel %vm517_vm4, %v2753_v31, 0.0 }
 0x1f1   :  { %v2453_v32 = vpop.eup %2452 }
 0x1f2   :  { %488 = vrot.lane.b32.xlu1 %v2453_v32, %s2574_s1 }
 0x1f8   :  { %v2455_v33 = vpop.eup %2454 }
 0x1f9   :  { %512 = vrot.lane.b32.xlu1 %v2455_v33, %s2574_s1 }
 0x264   :  { %v489_v35 = vpop.permute.xlu1 %488 }
 0x265   :  { %v491_v36 = vmul.f32 %v2449_v16, %v489_v35 }
 0x267   :  { %v2763_v37 = vsel %vm516_vm3, %v491_v36, 0.0 }
 0x268   :  { %520 = vrot.lane.b32.xlu0 %v2763_v37, %s2575_s23 }
 0x26b   :  { %v513_v38 = vpop.permute.xlu1 %512 }
 0x26c   :  { %v515_v39 = vmul.f32 %v2451_v22, %v513_v38  ;;  %v755_v22 = vld [vmem:[#allocation2 + $0x10] sm:$0xff] }
 0x26e   :  { %v2770_v40 = vsel %vm517_vm4, %v515_v39, 0.0 }
 0x26f   :  { %611 = vrot.lane.b32.xlu1 %v2770_v40, %s2575_s23 }
 0x2da   :  { %v521_v41 = vpop.permute.xlu0 %520 }
 0x2db   :  { %523 = vst.msk [vmem:[%s3218_s8] sm:$0xff] %vm320_vm5, %v521_v41  ;;  %2274 = vmatmul.mubr.msk.f32.vlgmr.msra.gmra.mrb[10].mxu0 %vm320_vm5, %v521_v41 }
 0x2dc   :  { %2397 = vmatpush3.bf16.msra.mxu0 %v2665_v18  ;;  %2287 = vmatprep.mubr.msk.f32.mxu0 %vm2569_vm1, %v2570_v27 }
 0x2dd   :  { %2401 = vmatprep.subr.bf16.mxu0 %v2568_v19 }
 0x2e1   :  { %v612_v42 = vpop.permute.xlu1 %611 }
 0x2e2   :  { %2281 = vmatmul.mubr.msk.f32.vlgmr.msra.gmra.mrb[10].mxu1 %vm320_vm5, %v612_v42 }
 0x2e3   :  { %2400 = vmatpush3.bf16.msra.mxu1 %v2672_v21  ;;  %2294 = vmatprep.mubr.msk.f32.mxu1 %vm2569_vm1, %v2570_v27 }
 0x2e4   :  { %2404 = vmatprep.subr.bf16.mxu1 %v2568_v19 }
 0x3ae   :  { %v604_v44 = vpop.f32.mrb[10].mxu0 }
 0x3af   :  { %v608_v45 = vadd.f32 %v604_v44, %v535_v43  ;;  %v2275_v46 = vpop.f32.mrb[11].mxu0 }
 0x3b1   :  { %2456 = vtanh.f32 %v608_v45  ;;  %v2104_v53 = vmul.f32 -1.442695, %v608_v45 }
 0x3b5   :  { %v681_v48 = vpop.f32.mrb[10].mxu1 }
 0x3b6   :  { %v685_v49 = vadd.f32 %v681_v48, %v610_v47  ;;  %v2282_v50 = vpop.f32.mrb[11].mxu1 }
 0x3b8   :  { %2458 = vtanh.f32 %v685_v49  ;;  %v2105_v54 = vmul.f32 -1.442695, %v685_v49 }
 0x3b9   :  { %2460 = vpow2.f32 %v2104_v53 }
 0x3ba   :  { %2462 = vpow2.f32 %v2105_v54 }
 0x3bb   :  { %v2457_v51 = vpop.eup %2456 }
 0x3bc   :  { %695 = vrot.lane.b32.xlu0 %v2457_v51, %s2572_s4 }
 0x3c2   :  { %v2459_v52 = vpop.eup %2458 }
 0x3c3   :  { %719 = vrot.lane.b32.xlu1 %v2459_v52, %s2572_s4  ;;  %v2461_v55 = vpop.eup %2460 }
 0x3c4   :  { %v689_v56 = vadd.f32 1.0, %v2461_v55  ;;  %v2463_v57 = vpop.eup %2462 }
 0x3c5   :  { %v713_v58 = vadd.f32 1.0, %v2463_v57 }
 0x3c6   :  { %2464 = vrcp.f32 %v689_v56 }
 0x3c7   :  { %2466 = vrcp.f32 %v713_v58 }
 0x3d0   :  { %v2465_v59 = vpop.eup %2464 }
 0x3d1   :  { %v2467_v62 = vpop.eup %2466  ;;  %v693_v2 = vmul.f32 %v2465_v59, %v2795_v1 }
 0x3d2   :  { %v717_v6 = vmul.f32 %v2467_v62, %v2804_v5 }
 0x42e   :  { %v696_v60 = vpop.permute.xlu0 %695 }
 0x42f   :  { %v698_v61 = vmul.f32 %v2465_v59, %v696_v60 }
 0x431   :  { %700 = vrot.lane.b32.xlu0 %v698_v61, %s2573_s2 }
 0x435   :  { %v720_v63 = vpop.permute.xlu1 %719 }
 0x436   :  { %v722_v0 = vmul.f32 %v2467_v62, %v720_v63 }
 0x438   :  { %724 = vrot.lane.b32.xlu1 %v722_v0, %s2573_s2 }
 0x4a3   :  { %v701_v3 = vpop.permute.xlu0 %700 }
 0x4a4   :  { %v2798_v4 = vadd.f32 %v701_v3, %v693_v2 }
 0x4a6   :  { %2468 = vtanh.f32 %v2798_v4  ;;  %v2852_v47 = vsel %vm734_vm6, %v2798_v4, %v2795_v1  ;;  %v979_v1 = vld [vmem:[#allocation2 + $0x18] sm:$0xff] }
 0x4aa   :  { %v725_v7 = vpop.permute.xlu1 %724 }
 0x4ab   :  { %v2807_v8 = vadd.f32 %v725_v7, %v717_v6 }
 0x4ad   :  { %2470 = vtanh.f32 %v2807_v8  ;;  %v2862_v51 = vsel %vm735_vm7, %v2807_v8, %v2804_v5  ;;  %v1057_v5 = vld [vmem:[#allocation3 + $0x20] sm:$0xff] }
 0x4b0   :  { %v2469_v9 = vpop.eup %2468 }
 0x4b1   :  { %706 = vrot.lane.b32.xlu0 %v2469_v9, %s2574_s1 }
 0x4b7   :  { %v2471_v10 = vpop.eup %2470 }
 0x4b8   :  { %730 = vrot.lane.b32.xlu1 %v2471_v10, %s2574_s1 }
 0x523   :  { %v707_v11 = vpop.permute.xlu0 %706 }
 0x524   :  { %v2812_v12 = vmul.f32 %v2465_v59, %v707_v11 }
 0x526   :  { %v2819_v13 = vsel %vm734_vm6, %v2812_v12, %v2763_v37 }
 0x527   :  { %757 = vrot.lane.b32.xlu0 %v2819_v13, %s2575_s23 }
 0x52a   :  { %v731_v14 = vpop.permute.xlu1 %730 }
 0x52b   :  { %v2823_v15 = vmul.f32 %v2467_v62, %v731_v14 }
 0x52d   :  { %v2830_v16 = vsel %vm735_vm7, %v2823_v15, %v2770_v40 }
 0x52e   :  { %835 = vrot.lane.b32.xlu1 %v2830_v16, %s2575_s23 }
 0x599   :  { %v758_v17 = vpop.permute.xlu0 %757 }
 0x59a   :  { %2288 = vmatmul.mubr.msk.f32.vlgmr.msra.gmra.mrb[12].mxu0 %vm320_vm5, %v758_v17 }
 0x59b   :  { %2403 = vmatpush3.bf16.msra.mxu0 %v2665_v18  ;;  %2301 = vmatprep.mubr.msk.f32.mxu0 %vm2569_vm1, %v2570_v27 }
 0x59c   :  { %2407 = vmatprep.subr.bf16.mxu0 %v2568_v19 }
 0x5a0   :  { %v836_v20 = vpop.permute.xlu1 %835 }
 0x5a1   :  { %2295 = vmatmul.mubr.msk.f32.vlgmr.msra.gmra.mrb[12].mxu1 %vm320_vm5, %v836_v20 }
 0x5a2   :  { %2406 = vmatpush3.bf16.msra.mxu1 %v2672_v21  ;;  %2308 = vmatprep.mubr.msk.f32.mxu1 %vm2569_vm1, %v2570_v27 }
 0x5a3   :  { %2410 = vmatprep.subr.bf16.mxu1 %v2568_v19 }
 0x66d   :  { %v827_v23 = vpop.f32.mrb[12].mxu0 }
 0x66e   :  { %v831_v24 = vadd.f32 %v827_v23, %v755_v22  ;;  %v2289_v25 = vpop.f32.mrb[13].mxu0 }
 0x670   :  { %2472 = vtanh.f32 %v831_v24  ;;  %v2110_v33 = vmul.f32 -1.442695, %v831_v24 }
 0x674   :  { %v905_v28 = vpop.f32.mrb[12].mxu1 }
 0x675   :  { %v909_v29 = vadd.f32 %v905_v28, %v833_v26  ;;  %v2296_v30 = vpop.f32.mrb[13].mxu1 }
 0x677   :  { %2474 = vtanh.f32 %v909_v29  ;;  %v2111_v35 = vmul.f32 -1.442695, %v909_v29 }
 0x678   :  { %2476 = vpow2.f32 %v2110_v33 }
 0x679   :  { %2478 = vpow2.f32 %v2111_v35 }
 0x67a   :  { %v2473_v31 = vpop.eup %2472 }
 0x67b   :  { %919 = vrot.lane.b32.xlu0 %v2473_v31, %s2572_s4 }
 0x681   :  { %v2475_v32 = vpop.eup %2474 }
 0x682   :  { %943 = vrot.lane.b32.xlu1 %v2475_v32, %s2572_s4  ;;  %v2477_v36 = vpop.eup %2476 }
 0x683   :  { %v913_v37 = vadd.f32 1.0, %v2477_v36  ;;  %v2479_v38 = vpop.eup %2478 }
 0x684   :  { %v937_v39 = vadd.f32 1.0, %v2479_v38 }
 0x685   :  { %2480 = vrcp.f32 %v913_v37 }
 0x686   :  { %2482 = vrcp.f32 %v937_v39 }
 0x68f   :  { %v2481_v41 = vpop.eup %2480 }
 0x690   :  { %v2483_v44 = vpop.eup %2482  ;;  %v917_v48 = vmul.f32 %v2481_v41, %v2852_v47 }
 0x691   :  { %v941_v52 = vmul.f32 %v2483_v44, %v2862_v51 }
 0x6ed   :  { %v920_v42 = vpop.permute.xlu0 %919 }
 0x6ee   :  { %v922_v43 = vmul.f32 %v2481_v41, %v920_v42 }
 0x6f0   :  { %924 = vrot.lane.b32.xlu0 %v922_v43, %s2573_s2 }
 0x6f4   :  { %v944_v45 = vpop.permute.xlu1 %943 }
 0x6f5   :  { %v946_v46 = vmul.f32 %v2483_v44, %v944_v45 }
 0x6f7   :  { %948 = vrot.lane.b32.xlu1 %v946_v46, %s2573_s2 }
 0x762   :  { %v925_v49 = vpop.permute.xlu0 %924 }
 0x763   :  { %v2855_v50 = vadd.f32 %v925_v49, %v917_v48  ;;  %v1203_v49 = vld [vmem:[#allocation2 + $0x20] sm:$0xff] }
 0x765   :  { %2484 = vtanh.f32 %v2855_v50  ;;  %v2910_v29 = vsel %vm958_vm8, %v2855_v50, %v2852_v47 }
 0x769   :  { %v949_v53 = vpop.permute.xlu1 %948 }
 0x76a   :  { %v2865_v54 = vadd.f32 %v949_v53, %v941_v52  ;;  %v1281_v53 = vld [vmem:[#allocation3 + $0x18] sm:$0xff] }
 0x76c   :  { %2486 = vtanh.f32 %v2865_v54  ;;  %v2920_v33 = vsel %vm959_vm9, %v2865_v54, %v2862_v51 }
 0x76f   :  { %v2485_v55 = vpop.eup %2484 }
 0x770   :  { %930 = vrot.lane.b32.xlu0 %v2485_v55, %s2574_s1 }
 0x776   :  { %v2487_v56 = vpop.eup %2486 }
 0x777   :  { %954 = vrot.lane.b32.xlu1 %v2487_v56, %s2574_s1 }
 0x7e2   :  { %v931_v57 = vpop.permute.xlu0 %930 }
 0x7e3   :  { %v2870_v58 = vmul.f32 %v2481_v41, %v931_v57 }
 0x7e5   :  { %v2877_v59 = vsel %vm958_vm8, %v2870_v58, %v2819_v13 }
 0x7e6   :  { %981 = vrot.lane.b32.xlu0 %v2877_v59, %s2575_s23 }
 0x7e9   :  { %v955_v60 = vpop.permute.xlu1 %954 }
 0x7ea   :  { %v2881_v61 = vmul.f32 %v2483_v44, %v955_v60 }
 0x7ec   :  { %v2888_v62 = vsel %vm959_vm9, %v2881_v61, %v2830_v16 }
 0x7ed   :  { %1059 = vrot.lane.b32.xlu1 %v2888_v62, %s2575_s23 }
 0x858   :  { %v982_v63 = vpop.permute.xlu0 %981 }
 0x859   :  { %2302 = vmatmul.mubr.msk.f32.vlgmr.msra.gmra.mrb[14].mxu0 %vm320_vm5, %v982_v63 }
 0x85a   :  { %2409 = vmatpush3.bf16.msra.mxu0 %v2665_v18  ;;  %2315 = vmatprep.mubr.msk.f32.mxu0 %vm2569_vm1, %v2570_v27 }
 0x85b   :  { %2413 = vmatprep.subr.bf16.mxu0 %v2568_v19 }
 0x85f   :  { %v1060_v0 = vpop.permute.xlu1 %1059 }
 0x860   :  { %2309 = vmatmul.mubr.msk.f32.vlgmr.msra.gmra.mrb[14].mxu1 %vm320_vm5, %v1060_v0 }
 0x861   :  { %2412 = vmatpush3.bf16.msra.mxu1 %v2672_v21  ;;  %2322 = vmatprep.mubr.msk.f32.mxu1 %vm2569_vm1, %v2570_v27 }
 0x862   :  { %2416 = vmatprep.subr.bf16.mxu1 %v2568_v19 }
 0x92c   :  { %v1051_v2 = vpop.f32.mrb[14].mxu0 }
 0x92d   :  { %v1055_v3 = vadd.f32 %v1051_v2, %v979_v1  ;;  %v2303_v4 = vpop.f32.mrb[15].mxu0 }
 0x92f   :  { %2488 = vtanh.f32 %v1055_v3  ;;  %v2116_v11 = vmul.f32 -1.442695, %v1055_v3 }
 0x933   :  { %v1129_v6 = vpop.f32.mrb[14].mxu1 }
 0x934   :  { %v1133_v7 = vadd.f32 %v1129_v6, %v1057_v5  ;;  %v2310_v8 = vpop.f32.mrb[15].mxu1 }
 0x936   :  { %2490 = vtanh.f32 %v1133_v7  ;;  %v2117_v13 = vmul.f32 -1.442695, %v1133_v7 }
 0x937   :  { %2492 = vpow2.f32 %v2116_v11 }
 0x938   :  { %2494 = vpow2.f32 %v2117_v13 }
 0x939   :  { %v2489_v9 = vpop.eup %2488 }
 0x93a   :  { %1143 = vrot.lane.b32.xlu0 %v2489_v9, %s2572_s4 }
 0x940   :  { %v2491_v10 = vpop.eup %2490 }
 0x941   :  { %1167 = vrot.lane.b32.xlu1 %v2491_v10, %s2572_s4  ;;  %v2493_v14 = vpop.eup %2492 }
 0x942   :  { %v1137_v16 = vadd.f32 1.0, %v2493_v14  ;;  %v2495_v17 = vpop.eup %2494 }
 0x943   :  { %v1161_v20 = vadd.f32 1.0, %v2495_v17 }
 0x944   :  { %2496 = vrcp.f32 %v1137_v16 }
 0x945   :  { %2498 = vrcp.f32 %v1161_v20 }
 0x94e   :  { %v2497_v22 = vpop.eup %2496 }
 0x94f   :  { %v2499_v25 = vpop.eup %2498  ;;  %v1141_v30 = vmul.f32 %v2497_v22, %v2910_v29 }
 0x950   :  { %v1165_v35 = vmul.f32 %v2499_v25, %v2920_v33 }
 0x9ac   :  { %v1144_v23 = vpop.permute.xlu0 %1143 }
 0x9ad   :  { %v1146_v24 = vmul.f32 %v2497_v22, %v1144_v23 }
 0x9af   :  { %1148 = vrot.lane.b32.xlu0 %v1146_v24, %s2573_s2 }
 0x9b3   :  { %v1168_v26 = vpop.permute.xlu1 %1167 }
 0x9b4   :  { %v1170_v28 = vmul.f32 %v2499_v25, %v1168_v26 }
 0x9b6   :  { %1172 = vrot.lane.b32.xlu1 %v1170_v28, %s2573_s2 }
 0xa21   :  { %v1149_v31 = vpop.permute.xlu0 %1148 }
 0xa22   :  { %v2913_v32 = vadd.f32 %v1149_v31, %v1141_v30 }
 0xa24   :  { %2500 = vtanh.f32 %v2913_v32  ;;  %v2968_v9 = vsel %vm1182_vm10, %v2913_v32, %v2910_v29 }
 0xa28   :  { %v1173_v36 = vpop.permute.xlu1 %1172 }
 0xa29   :  { %v2923_v37 = vadd.f32 %v1173_v36, %v1165_v35 }
 0xa2b   :  { %2502 = vtanh.f32 %v2923_v37  ;;  %v2975_v14 = vsel %vm1183_vm11, %v2923_v37, %v2920_v33  ;;  %v1423_v33 = vld [vmem:[#allocation2 + $0x28] sm:$0xff] }
 0xa2e   :  { %v2501_v38 = vpop.eup %2500 }
 0xa2f   :  { %1154 = vrot.lane.b32.xlu0 %v2501_v38, %s2574_s1  ;;  %v1501_v38 = vld [vmem:[#allocation3 + $0x10] sm:$0xff] }
 0xa35   :  { %v2503_v39 = vpop.eup %2502 }
 0xa36   :  { %1178 = vrot.lane.b32.xlu1 %v2503_v39, %s2574_s1 }
 0xaa1   :  { %v1155_v41 = vpop.permute.xlu0 %1154 }
 0xaa2   :  { %v2928_v42 = vmul.f32 %v2497_v22, %v1155_v41 }
 0xaa4   :  { %v2935_v43 = vsel %vm1182_vm10, %v2928_v42, %v2877_v59 }
 0xaa5   :  { %1205 = vrot.lane.b32.xlu0 %v2935_v43, %s2575_s23 }
 0xaa8   :  { %v1179_v44 = vpop.permute.xlu1 %1178 }
 0xaa9   :  { %v2939_v45 = vmul.f32 %v2499_v25, %v1179_v44 }
 0xaab   :  { %v2946_v46 = vsel %vm1183_vm11, %v2939_v45, %v2888_v62 }
 0xaac   :  { %1283 = vrot.lane.b32.xlu1 %v2946_v46, %s2575_s23 }
 0xb17   :  { %v1206_v47 = vpop.permute.xlu0 %1205 }
 0xb18   :  { %2316 = vmatmul.mubr.msk.f32.vlgmr.msra.gmra.mrb[16].mxu0 %vm320_vm5, %v1206_v47 }
 0xb19   :  { %2415 = vmatpush3.bf16.msra.mxu0 %v2665_v18  ;;  %2329 = vmatprep.mubr.msk.f32.mxu0 %vm2569_vm1, %v2570_v27 }
 0xb1a   :  { %2419 = vmatprep.subr.bf16.mxu0 %v2568_v19 }
 0xb1e   :  { %v1284_v48 = vpop.permute.xlu1 %1283 }
 0xb1f   :  { %2323 = vmatmul.mubr.msk.f32.vlgmr.msra.gmra.mrb[16].mxu1 %vm320_vm5, %v1284_v48 }
 0xb20   :  { %2418 = vmatpush3.bf16.msra.mxu1 %v2672_v21  ;;  %2336 = vmatprep.mubr.msk.f32.mxu1 %vm2569_vm1, %v2570_v27 }
 0xb21   :  { %2422 = vmatprep.subr.bf16.mxu1 %v2568_v19 }
 0xbeb   :  { %v1275_v50 = vpop.f32.mrb[16].mxu0 }
 0xbec   :  { %v1279_v51 = vadd.f32 %v1275_v50, %v1203_v49  ;;  %v2317_v52 = vpop.f32.mrb[17].mxu0 }
 0xbee   :  { %2504 = vtanh.f32 %v1279_v51  ;;  %v2122_v60 = vmul.f32 -1.442695, %v1279_v51 }
 0xbf2   :  { %v1353_v54 = vpop.f32.mrb[16].mxu1 }
 0xbf3   :  { %v1357_v55 = vadd.f32 %v1353_v54, %v1281_v53  ;;  %v2324_v56 = vpop.f32.mrb[17].mxu1 }
 0xbf5   :  { %2506 = vtanh.f32 %v1357_v55  ;;  %v2123_v62 = vmul.f32 -1.442695, %v1357_v55 }
 0xbf6   :  { %2508 = vpow2.f32 %v2122_v60 }
 0xbf7   :  { %2510 = vpow2.f32 %v2123_v62 }
 0xbf8   :  { %v2505_v57 = vpop.eup %2504 }
 0xbf9   :  { %1367 = vrot.lane.b32.xlu0 %v2505_v57, %s2572_s4 }
 0xbff   :  { %v2507_v59 = vpop.eup %2506 }
 0xc00   :  { %1391 = vrot.lane.b32.xlu1 %v2507_v59, %s2572_s4  ;;  %v2509_v63 = vpop.eup %2508 }
 0xc01   :  { %v1361_v0 = vadd.f32 1.0, %v2509_v63  ;;  %v2511_v1 = vpop.eup %2510 }
 0xc02   :  { %v1385_v2 = vadd.f32 1.0, %v2511_v1 }
 0xc03   :  { %2512 = vrcp.f32 %v1361_v0 }
 0xc04   :  { %2514 = vrcp.f32 %v1385_v2 }
 0xc0d   :  { %v2513_v3 = vpop.eup %2512 }
 0xc0e   :  { %v2515_v6 = vpop.eup %2514  ;;  %v1365_v10 = vmul.f32 %v2513_v3, %v2968_v9 }
 0xc0f   :  { %v1389_v16 = vmul.f32 %v2515_v6, %v2975_v14 }
 0xc6b   :  { %v1368_v4 = vpop.permute.xlu0 %1367 }
 0xc6c   :  { %v1370_v5 = vmul.f32 %v2513_v3, %v1368_v4 }
 0xc6e   :  { %1372 = vrot.lane.b32.xlu0 %v1370_v5, %s2573_s2 }
 0xc72   :  { %v1392_v7 = vpop.permute.xlu1 %1391 }
 0xc73   :  { %v1394_v8 = vmul.f32 %v2515_v6, %v1392_v7 }
 0xc75   :  { %1396 = vrot.lane.b32.xlu1 %v1394_v8, %s2573_s2 }
 0xce0   :  { %v1373_v11 = vpop.permute.xlu0 %1372 }
 0xce1   :  { %v1375_v13 = vadd.f32 %v1373_v11, %v1365_v10 }
 0xce3   :  { %2516 = vtanh.f32 %v1375_v13  ;;  %v3017_v59 = vsel %vm1183_vm11, %v1375_v13, %v2968_v9 }
 0xce7   :  { %v1397_v17 = vpop.permute.xlu1 %1396 }
 0xce8   :  { %v1399_v20 = vadd.f32 %v1397_v17, %v1389_v16  ;;  %v1643_v16 = vld [vmem:[#allocation2 + $0x30] sm:$0xff] }
 0xcea   :  { %2518 = vtanh.f32 %v1399_v20  ;;  %v3023_v0 = vsel %vm1182_vm10, %v1399_v20, %v2975_v14 }
 0xced   :  { %v2517_v22 = vpop.eup %2516 }
 0xcee   :  { %1378 = vrot.lane.b32.xlu0 %v2517_v22, %s2574_s1 }
 0xcf4   :  { %v2519_v23 = vpop.eup %2518 }
 0xcf5   :  { %1402 = vrot.lane.b32.xlu1 %v2519_v23, %s2574_s1  ;;  %v1721_v23 = vld [vmem:[#allocation3 + $0x8] sm:$0xff] }
 0xd60   :  { %v1379_v24 = vpop.permute.xlu0 %1378 }
 0xd61   :  { %v2980_v25 = vmul.f32 %v2513_v3, %v1379_v24 }
 0xd63   :  { %v2986_v26 = vsel %vm1183_vm11, %v2980_v25, %v2935_v43 }
 0xd64   :  { %1425 = vrot.lane.b32.xlu0 %v2986_v26, %s2575_s23 }
 0xd67   :  { %v1403_v28 = vpop.permute.xlu1 %1402 }
 0xd68   :  { %v2990_v29 = vmul.f32 %v2515_v6, %v1403_v28 }
 0xd6a   :  { %v2996_v30 = vsel %vm1182_vm10, %v2990_v29, %v2946_v46 }
 0xd6b   :  { %1503 = vrot.lane.b32.xlu1 %v2996_v30, %s2575_s23 }
 0xdd6   :  { %v1426_v31 = vpop.permute.xlu0 %1425 }
 0xdd7   :  { %2330 = vmatmul.mubr.msk.f32.vlgmr.msra.gmra.mrb[18].mxu0 %vm320_vm5, %v1426_v31 }
 0xdd8   :  { %2421 = vmatpush3.bf16.msra.mxu0 %v2665_v18  ;;  %2343 = vmatprep.mubr.msk.f32.mxu0 %vm2569_vm1, %v2570_v27 }
 0xdd9   :  { %2425 = vmatprep.subr.bf16.mxu0 %v2568_v19 }
 0xddd   :  { %v1504_v32 = vpop.permute.xlu1 %1503 }
 0xdde   :  { %2337 = vmatmul.mubr.msk.f32.vlgmr.msra.gmra.mrb[18].mxu1 %vm320_vm5, %v1504_v32 }
 0xddf   :  { %2424 = vmatpush3.bf16.msra.mxu1 %v2672_v21  ;;  %2350 = vmatprep.mubr.msk.f32.mxu1 %vm2569_vm1, %v2570_v27 }
 0xde0   :  { %2428 = vmatprep.subr.bf16.mxu1 %v2568_v19 }
 0xeaa   :  { %v1495_v35 = vpop.f32.mrb[18].mxu0 }
 0xeab   :  { %v1499_v36 = vadd.f32 %v1495_v35, %v1423_v33  ;;  %v2331_v37 = vpop.f32.mrb[19].mxu0 }
 0xead   :  { %2520 = vtanh.f32 %v1499_v36  ;;  %v2128_v47 = vmul.f32 -1.442695, %v1499_v36 }
 0xeb1   :  { %v1573_v39 = vpop.f32.mrb[18].mxu1 }
 0xeb2   :  { %v1577_v41 = vadd.f32 %v1573_v39, %v1501_v38  ;;  %v2338_v43 = vpop.f32.mrb[19].mxu1 }
 0xeb4   :  { %2522 = vtanh.f32 %v1577_v41  ;;  %v2129_v48 = vmul.f32 -1.442695, %v1577_v41 }
 0xeb5   :  { %2524 = vpow2.f32 %v2128_v47 }
 0xeb6   :  { %2526 = vpow2.f32 %v2129_v48 }
 0xeb7   :  { %v2521_v44 = vpop.eup %2520 }
 0xeb8   :  { %1587 = vrot.lane.b32.xlu0 %v2521_v44, %s2572_s4 }
 0xebe   :  { %v2523_v46 = vpop.eup %2522 }
 0xebf   :  { %1611 = vrot.lane.b32.xlu1 %v2523_v46, %s2572_s4  ;;  %v2525_v19 = vpop.eup %2524 }
 0xec0   :  { %v1581_v49 = vadd.f32 1.0, %v2525_v19  ;;  %v2527_v50 = vpop.eup %2526 }
 0xec1   :  { %v1605_v51 = vadd.f32 1.0, %v2527_v50 }
 0xec2   :  { %2528 = vrcp.f32 %v1581_v49 }
 0xec3   :  { %2530 = vrcp.f32 %v1605_v51 }
 0xecc   :  { %v2529_v52 = vpop.eup %2528 }
 0xecd   :  { %v2531_v55 = vpop.eup %2530  ;;  %v1585_v60 = vmul.f32 %v2529_v52, %v3017_v59 }
 0xece   :  { %v1609_v1 = vmul.f32 %v2531_v55, %v3023_v0 }
 0xf2a   :  { %v1588_v53 = vpop.permute.xlu0 %1587 }
 0xf2b   :  { %v1590_v54 = vmul.f32 %v2529_v52, %v1588_v53 }
 0xf2d   :  { %1592 = vrot.lane.b32.xlu0 %v1590_v54, %s2573_s2 }
 0xf31   :  { %v1612_v56 = vpop.permute.xlu1 %1611 }
 0xf32   :  { %v1614_v57 = vmul.f32 %v2531_v55, %v1612_v56 }
 0xf34   :  { %1616 = vrot.lane.b32.xlu1 %v1614_v57, %s2573_s2 }
 0xf9f   :  { %v1593_v62 = vpop.permute.xlu0 %1592 }
 0xfa0   :  { %v1595_v63 = vadd.f32 %v1593_v62, %v1585_v60 }
 0xfa2   :  { %2532 = vtanh.f32 %v1595_v63  ;;  %v1639_v44 = vsel %vm959_vm9, %v1595_v63, %v3017_v59 }
 0xfa6   :  { %v1617_v2 = vpop.permute.xlu1 %1616 }
 0xfa7   :  { %v1619_v3 = vadd.f32 %v1617_v2, %v1609_v1 }
 0xfa9   :  { %2534 = vtanh.f32 %v1619_v3  ;;  %v1641_v19 = vsel %vm958_vm8, %v1619_v3, %v3023_v0  ;;  %v1863_v0 = vld [vmem:[#allocation2 + $0x38] sm:$0xff] }
 0xfac   :  { %v2533_v4 = vpop.eup %2532 }
 0xfad   :  { %1598 = vrot.lane.b32.xlu0 %v2533_v4, %s2574_s1  ;;  %v1940_v4 = vld [vmem:[#allocation3] sm:$0xff] }
 0xfb3   :  { %v2535_v5 = vpop.eup %2534 }
 0xfb4   :  { %1622 = vrot.lane.b32.xlu1 %v2535_v5, %s2574_s1 }
0x101f   :  { %v1599_v6 = vpop.permute.xlu0 %1598 }
0x1020   :  { %v3028_v7 = vmul.f32 %v2529_v52, %v1599_v6 }
0x1022   :  { %v3034_v8 = vsel %vm959_vm9, %v3028_v7, %v2986_v26 }
0x1023   :  { %1645 = vrot.lane.b32.xlu0 %v3034_v8, %s2575_s23 }
0x1026   :  { %v1623_v9 = vpop.permute.xlu1 %1622 }
0x1027   :  { %v3038_v10 = vmul.f32 %v2531_v55, %v1623_v9 }
0x1029   :  { %v3044_v11 = vsel %vm958_vm8, %v3038_v10, %v2996_v30 }
0x102a   :  { %1723 = vrot.lane.b32.xlu1 %v3044_v11, %s2575_s23 }
0x1095   :  { %v1646_v13 = vpop.permute.xlu0 %1645 }
0x1096   :  { %2344 = vmatmul.mubr.msk.f32.vlgmr.msra.gmra.mrb[20].mxu0 %vm320_vm5, %v1646_v13 }
0x1097   :  { %2427 = vmatpush3.bf16.msra.mxu0 %v2665_v18  ;;  %2357 = vmatprep.mubr.msk.f32.mxu0 %vm2569_vm1, %v2570_v27 }
0x109c   :  { %v1724_v14 = vpop.permute.xlu1 %1723 }
0x109d   :  { %2351 = vmatmul.mubr.msk.f32.vlgmr.msra.gmra.mrb[20].mxu1 %vm320_vm5, %v1724_v14 }
0x109e   :  { %2430 = vmatpush3.bf16.msra.mxu1 %v2672_v21  ;;  %2364 = vmatprep.mubr.msk.f32.mxu1 %vm2569_vm1, %v2570_v27 }
0x1169   :  { %v1715_v17 = vpop.f32.mrb[20].mxu0 }
0x116a   :  { %v1719_v20 = vadd.f32 %v1715_v17, %v1643_v16  ;;  %v2345_v22 = vpop.f32.mrb[21].mxu0 }
0x116c   :  { %2536 = vtanh.f32 %v1719_v20  ;;  %v2134_v21 = vmul.f32 -1.442695, %v1719_v20 }
0x1170   :  { %v1793_v24 = vpop.f32.mrb[20].mxu1 }
0x1171   :  { %v1797_v26 = vadd.f32 %v1793_v24, %v1721_v23  ;;  %v2352_v18 = vpop.f32.mrb[21].mxu1 }
0x1173   :  { %2538 = vtanh.f32 %v1797_v26  ;;  %v2135_v31 = vmul.f32 -1.442695, %v1797_v26 }
0x1174   :  { %2540 = vpow2.f32 %v2134_v21 }
0x1175   :  { %2542 = vpow2.f32 %v2135_v31 }
0x1176   :  { %v2537_v28 = vpop.eup %2536 }
0x1177   :  { %1807 = vrot.lane.b32.xlu0 %v2537_v28, %s2572_s4 }
0x117d   :  { %v2539_v30 = vpop.eup %2538 }
0x117e   :  { %1831 = vrot.lane.b32.xlu1 %v2539_v30, %s2572_s4  ;;  %v2541_v27 = vpop.eup %2540 }
0x117f   :  { %v1801_v32 = vadd.f32 1.0, %v2541_v27  ;;  %v2543_v33 = vpop.eup %2542 }
0x1180   :  { %v1825_v35 = vadd.f32 1.0, %v2543_v33 }
0x1181   :  { %2544 = vrcp.f32 %v1801_v32 }
0x1182   :  { %2546 = vrcp.f32 %v1825_v35 }
0x118b   :  { %v2545_v36 = vpop.eup %2544 }
0x118c   :  { %v2547_v39 = vpop.eup %2546  ;;  %v1805_v46 = vmul.f32 %v2545_v36, %v1639_v44 }
0x118d   :  { %v1829_v49 = vmul.f32 %v2547_v39, %v1641_v19 }
0x11e9   :  { %v1808_v37 = vpop.permute.xlu0 %1807 }
0x11ea   :  { %v1810_v38 = vmul.f32 %v2545_v36, %v1808_v37 }
0x11ec   :  { %1812 = vrot.lane.b32.xlu0 %v1810_v38, %s2573_s2 }
0x11f0   :  { %v1832_v41 = vpop.permute.xlu1 %1831 }
0x11f1   :  { %v1834_v43 = vmul.f32 %v2547_v39, %v1832_v41  ;;  %v743_v41 = vsel %vm735_vm7, %v2823_v15, 0.0  ;;  %v1191_v15 = vsel %vm1183_vm11, %v2939_v45, 0.0  ;;  %v1632_v45 = vsel %vm958_vm8, %v3038_v10, 0.0 }
0x11f3   :  { %1836 = vrot.lane.b32.xlu1 %v1834_v43, %s2573_s2  ;;  %v736_v43 = vsel %vm734_vm6, %v2812_v12, 0.0  ;;  %v1184_v12 = vsel %vm1182_vm10, %v2928_v42, 0.0  ;;  %v1626_v42 = vsel %vm959_vm9, %v3028_v7, 0.0 }
0x125e   :  { %v1813_v47 = vpop.permute.xlu0 %1812 }
0x125f   :  { %v1815_v48 = vadd.f32 %v1813_v47, %v1805_v46 }
0x1261   :  { %2548 = vtanh.f32 %v1815_v48  ;;  %v1859_v21 = vsel %vm735_vm7, %v1815_v48, %v1639_v44  ;;  %v967_v44 = vsel %vm959_vm9, %v2881_v61, 0.0  ;;  %v1412_v61 = vsel %vm1182_vm10, %v2990_v29, 0.0 }
0x1265   :  { %v1837_v50 = vpop.permute.xlu1 %1836 }
0x1266   :  { %v1839_v51 = vadd.f32 %v1837_v50, %v1829_v49 }
0x1268   :  { %2550 = vtanh.f32 %v1839_v51  ;;  %v1861_v33 = vsel %vm734_vm6, %v1839_v51, %v1641_v19 }
0x126b   :  { %v2549_v52 = vpop.eup %2548 }
0x126c   :  { %1818 = vrot.lane.b32.xlu0 %v2549_v52, %s2574_s1 }
0x1272   :  { %v2551_v53 = vpop.eup %2550 }
0x1273   :  { %1842 = vrot.lane.b32.xlu1 %v2551_v53, %s2574_s1 }
0x12de   :  { %v1819_v54 = vpop.permute.xlu0 %1818 }
0x12df   :  { %v3068_v55 = vmul.f32 %v2545_v36, %v1819_v54 }
0x12e1   :  { %v1858_v56 = vsel %vm735_vm7, %v3068_v55, %v3034_v8 }
0x12e2   :  { %1865 = vrot.lane.b32.xlu0 %v1858_v56, %s2575_s23 }
0x12e5   :  { %v1843_v57 = vpop.permute.xlu1 %1842 }
0x12e6   :  { %v3075_v59 = vmul.f32 %v2547_v39, %v1843_v57 }
0x12e8   :  { %v1860_v60 = vsel %vm734_vm6, %v3075_v59, %v3044_v11  ;;  %v1852_v29 = vsel %vm734_vm6, %v3075_v59, 0.0 }
0x12e9   :  { %1942 = vrot.lane.b32.xlu1 %v1860_v60, %s2575_s23 }
0x1354   :  { %v1866_v62 = vpop.permute.xlu0 %1865 }
0x1355   :  { %2358 = vmatmul.mubr.msk.f32.vlgmr.msra.gmra.mrb[22].mxu0 %vm320_vm5, %v1866_v62 }
0x135b   :  { %v1943_v63 = vpop.permute.xlu1 %1942 }
0x135c   :  { %2365 = vmatmul.mubr.msk.f32.vlgmr.msra.gmra.mrb[22].mxu1 %vm320_vm5, %v1943_v63 }
0x1428   :  { %v1935_v1 = vpop.f32.mrb[22].mxu0 }
0x1429   :  { %v1939_v2 = vadd.f32 %v1935_v1, %v1863_v0  ;;  %v2359_v3 = vpop.f32.mrb[23].mxu0 }
0x142b   :  { %2552 = vtanh.f32 %v1939_v2  ;;  %v2140_v13 = vmul.f32 -1.442695, %v1939_v2 }
0x142f   :  { %v2012_v5 = vpop.f32.mrb[22].mxu1 }
0x1430   :  { %v2016_v6 = vadd.f32 %v2012_v5, %v1940_v4  ;;  %v2366_v8 = vpop.f32.mrb[23].mxu1 }
0x1432   :  { %2554 = vtanh.f32 %v2016_v6  ;;  %v2141_v14 = vmul.f32 -1.442695, %v2016_v6 }
0x1433   :  { %2556 = vpow2.f32 %v2140_v13 }
0x1434   :  { %2558 = vpow2.f32 %v2141_v14 }
0x1435   :  { %v2553_v9 = vpop.eup %2552 }
0x1436   :  { %2026 = vrot.lane.b32.xlu0 %v2553_v9, %s2572_s4 }
0x143c   :  { %v2555_v11 = vpop.eup %2554 }
0x143d   :  { %2050 = vrot.lane.b32.xlu1 %v2555_v11, %s2572_s4  ;;  %v2557_v16 = vpop.eup %2556 }
0x143e   :  { %v2020_v17 = vadd.f32 1.0, %v2557_v16  ;;  %v2559_v20 = vpop.eup %2558 }
0x143f   :  { %v2044_v22 = vadd.f32 1.0, %v2559_v20 }
0x1440   :  { %2560 = vrcp.f32 %v2020_v17 }
0x1441   :  { %2562 = vrcp.f32 %v2044_v22 }
0x144a   :  { %v2561_v23 = vpop.eup %2560 }
0x144b   :  { %v2563_v18 = vpop.eup %2562  ;;  %v2024_v31 = vmul.f32 %v2561_v23, %v1859_v21 }
0x144c   :  { %v2048_v35 = vmul.f32 %v2563_v18, %v1861_v33 }
0x14a8   :  { %v2027_v24 = vpop.permute.xlu0 %2026 }
0x14a9   :  { %v2029_v26 = vmul.f32 %v2561_v23, %v2027_v24 }
0x14ab   :  { %2031 = vrot.lane.b32.xlu0 %v2029_v26, %s2573_s2 }
0x14af   :  { %v2051_v28 = vpop.permute.xlu1 %2050 }
0x14b0   :  { %v2053_v30 = vmul.f32 %v2563_v18, %v2051_v28 }
0x14b2   :  { %2055 = vrot.lane.b32.xlu1 %v2053_v30, %s2573_s2 }
0x151d   :  { %v2032_v27 = vpop.permute.xlu0 %2031 }
0x151e   :  { %v2034_v32 = vadd.f32 %v2032_v27, %v2024_v31 }
0x1520   :  { %2564 = vtanh.f32 %v2034_v32 }
0x1524   :  { %v2056_v36 = vpop.permute.xlu1 %2055 }
0x1525   :  { %v2058_v37 = vadd.f32 %v2056_v36, %v2048_v35 }
0x1527   :  { %2566 = vtanh.f32 %v2058_v37 }
0x152a   :  { %v2565_v38 = vpop.eup %2564 }
0x152b   :  { %2037 = vrot.lane.b32.xlu0 %v2565_v38, %s2574_s1 }
0x152f   :  { %526 = vrot.lane.b32.xlu0 %v2770_v40, %s2572_s4  ;;  %v960_v40 = vsel %vm958_vm8, %v2870_v58, 0.0  ;;  %v1406_v58 = vsel %vm1183_vm11, %v2980_v25, 0.0  ;;  %v1846_v25 = vsel %vm735_vm7, %v3068_v55, 0.0 }
0x1531   :  { %v2567_v39 = vpop.eup %2566 }
0x1532   :  { %2061 = vrot.lane.b32.xlu1 %v2567_v39, %s2574_s1 }
0x1533   :  { %745 = vrot.lane.b32.xlu0 %v743_v41, %s2572_s4 }
0x1536   :  { %738 = vrot.lane.b32.xlu1 %v736_v43, %s2575_s23 }
0x1537   :  { %969 = vrot.lane.b32.xlu0 %v967_v44, %s2572_s4 }
0x153a   :  { %962 = vrot.lane.b32.xlu1 %v960_v40, %s2575_s23 }
0x153b   :  { %1193 = vrot.lane.b32.xlu0 %v1191_v15, %s2572_s4 }
0x153e   :  { %1186 = vrot.lane.b32.xlu1 %v1184_v12, %s2575_s23 }
0x153f   :  { %1414 = vrot.lane.b32.xlu0 %v1412_v61, %s2572_s4 }
0x1542   :  { %1408 = vrot.lane.b32.xlu1 %v1406_v58, %s2575_s23 }
0x1543   :  { %1634 = vrot.lane.b32.xlu0 %v1632_v45, %s2572_s4 }
0x1546   :  { %1628 = vrot.lane.b32.xlu1 %v1626_v42, %s2575_s23 }
0x1547   :  { %1854 = vrot.lane.b32.xlu0 %v1852_v29, %s2572_s4 }
0x154a   :  { %1848 = vrot.lane.b32.xlu1 %v1846_v25, %s2575_s23 }
0x159d   :  { %v2038_v10 = vpop.permute.xlu0 %2037 }
0x159e   :  { %v2040_v46 = vmul.f32 %v2561_v23, %v2038_v10 }
0x15a0   :  { %v2065_v7 = vsel %vm517_vm4, %v2040_v46, 0.0 }
0x15a1   :  { %v527_v47 = vpop.permute.xlu0 %526  ;;  %2067 = vrot.lane.b32.xlu1 %v2065_v7, %s2575_s23 }
0x15a2   :  { %2101 = vst.msk [vmem:[%s3218_s8 + $0x38] sm:$0xff] %vm530_vm12, %v527_v47 }
0x15a4   :  { %v2062_v48 = vpop.permute.xlu1 %2061 }
0x15a5   :  { %v2064_v19 = vmul.f32 %v2563_v18, %v2062_v48  ;;  %v746_v49 = vpop.permute.xlu0 %745 }
0x15a6   :  { %2107 = vst.msk [vmem:[%s3218_s8 + $0x30] sm:$0xff] %vm530_vm12, %v746_v49 }
0x15a7   :  { %v2071_v50 = vsel %vm516_vm3, %v2064_v19, 0.0 }
0x15a8   :  { %2073 = vrot.lane.b32.xlu0 %v2071_v50, %s2572_s4  ;;  %v739_v51 = vpop.permute.xlu1 %738 }
0x15a9   :  { %2106 = vst.msk [vmem:[%s3218_s8 + $0x8] sm:$0xff] %vm320_vm5, %v739_v51  ;;  %v970_v52 = vpop.permute.xlu0 %969 }
0x15aa   :  { %2113 = vst.msk [vmem:[%s3218_s8 + $0x28] sm:$0xff] %vm530_vm12, %v970_v52 }
0x15ac   :  { %v963_v53 = vpop.permute.xlu1 %962 }
0x15ad   :  { %2112 = vst.msk [vmem:[%s3218_s8 + $0x10] sm:$0xff] %vm320_vm5, %v963_v53  ;;  %v1194_v34 = vpop.permute.xlu0 %1193 }
0x15ae   :  { %2119 = vst.msk [vmem:[%s3218_s8 + $0x20] sm:$0xff] %vm530_vm12, %v1194_v34 }
0x15b0   :  { %v1187_v54 = vpop.permute.xlu1 %1186 }
0x15b1   :  { %2118 = vst.msk [vmem:[%s3218_s8 + $0x18] sm:$0xff] %vm320_vm5, %v1187_v54  ;;  %v1415_v55 = vpop.permute.xlu0 %1414 }
0x15b2   :  { %2125 = vst.msk [vmem:[%s3218_s8 + $0x18] sm:$0xff] %vm530_vm12, %v1415_v55 }
0x15b4   :  { %v1409_v56 = vpop.permute.xlu1 %1408 }
0x15b5   :  { %2124 = vst.msk [vmem:[%s3218_s8 + $0x20] sm:$0xff] %vm320_vm5, %v1409_v56  ;;  %v1635_v57 = vpop.permute.xlu0 %1634 }
0x15b6   :  { %2131 = vst.msk [vmem:[%s3218_s8 + $0x10] sm:$0xff] %vm530_vm12, %v1635_v57 }
0x15b8   :  { %v1629_v59 = vpop.permute.xlu1 %1628 }
0x15b9   :  { %2130 = vst.msk [vmem:[%s3218_s8 + $0x28] sm:$0xff] %vm320_vm5, %v1629_v59  ;;  %v1855_v60 = vpop.permute.xlu0 %1854 }
0x15ba   :  { %2137 = vst.msk [vmem:[%s3218_s8 + $0x8] sm:$0xff] %vm530_vm12, %v1855_v60 }
0x15bc   :  { %v1849_v62 = vpop.permute.xlu1 %1848 }
0x15bd   :  { %2136 = vst.msk [vmem:[%s3218_s8 + $0x30] sm:$0xff] %vm320_vm5, %v1849_v62 }
0x1613   :  { %v2068_v63 = vpop.permute.xlu1 %2067 }
0x1614   :  { %2142 = vst.msk [vmem:[%s3218_s8 + $0x38] sm:$0xff] %vm320_vm5, %v2068_v63 }
0x161a   :  { %v2074_v0 = vpop.permute.xlu0 %2073 }
0x161b   :  { %2076 = vst.msk [vmem:[%s3218_s8] sm:$0xff] %vm530_vm12, %v2074_v0 }

</bundles_post_ra>
